<compile_context>
chip_gen: v7x
topology: tpu7x:2x2x1
jax: 0.10.0
libtpu: 0.0.40
codegen_flags: <defaults>
</compile_context>

<pallas_src>
import jax
import jax.numpy as jnp
from jax import lax
from jax.experimental import pallas as pl
from jax.experimental.pallas import tpu as pltpu

_EPS = 1e-5


def _round_up(x, m):
    return (x + m - 1) // m * m


def _vmem_limit_bytes():
    """Per-generation scoped-VMEM budget (item 4 of the review)."""
    cap = 64 * 1024 * 1024                       # conservative fallback (v7x)
    try:
        cap = int(pltpu.get_tpu_info().vmem_capacity_bytes)
    except Exception:
        pass
    # 3/4 of physical, clamped: 48 MiB on v7x, 96 MiB on v5e/v6e.
    return max(32 * 1024 * 1024, min(cap * 3 // 4, 100 * 1024 * 1024))


def conv2d_ibnorm_relu(x_nchw, weight, bias, gamma_bn, beta_bn, *,
                       stride=1, padding=1, block_rows=None,
                       intermediate_dtype=jnp.float32):
    """Fused Conv2d -> IBNorm (BN half + IN half, training stats) -> ReLU.

    x_nchw: [N, Cin, H, W]; weight: [Cout, Cin, kh, kw]. Returns NCHW float32.
    """
    n, cin, h, w = x_nchw.shape
    cout, _, kh, kw = weight.shape
    cb = cout // 2                               # BatchNorm half; rest is IN

    # The conv bias cancels exactly against the per-channel mean subtraction of
    # both norm halves (training-mode stats), so the kernels never touch it.
    del bias

    x = x_nchw.astype(jnp.float32)
    h_out = (h + 2 * padding - kh) // stride + 1
    w_out = (w + 2 * padding - kw) // stride + 1
    hw = h_out * w_out

    # ---- output-row tiling (target ~2 MiB output tiles, TR multiple of 8) ---
    if block_rows is None:
        lane_w = max(_round_up(w_out, 128), 128)
        tr = (2 * 1024 * 1024) // (cout * lane_w * 4)
    else:
        tr = int(block_rows)
    tr = max(8, (tr // 8) * 8)
    tr = min(tr, _round_up(h_out, 8))

    n_rt = -(-h_out // tr)
    # Split the row-tile axis 2-ways so both v7x TensorCores get work at N==1.
    n_split = 2 if n_rt >= 2 else 1
    n_rt_pad = _round_up(n_rt, n_split)
    n_rt_in = n_rt_pad // n_split
    h_out_pad = n_rt_pad * tr
    mask_rows = h_out_pad > h_out

    # ---- pad input once: conv padding + zero rows for the padded row-tiles --
    rows_needed = stride * (h_out_pad - 1) + kh
    pad_bottom = max(0, rows_needed - (h + 2 * padding))
    x_pad = jnp.pad(x, ((0, 0), (0, 0),
                        (padding, padding + pad_bottom),
                        (padding, padding)))
    rows_tot = h + 2 * padding + pad_bottom
    w_pad = w + 2 * padding

    # weight as [kh*kw, Cout, Cin] so w_ref[i*kw + j] is the (i, j) tap matrix.
    w_taps = (weight.astype(jnp.float32)
              .transpose(2, 3, 0, 1).reshape(kh * kw, cout, cin))

    grid = (n, n_split, n_rt_in)
    vmem_limit = _vmem_limit_bytes()

    # ------------------ Pass 1: halo conv + lane-parallel stats --------------
    def conv_stats_kernel(x_ref, w_ref, y_ref, sum_ref, sq_ref):
        # x_ref : [Cin, rows_tot, w_pad]   whole padded sample, VMEM-resident
        # w_ref : [kh*kw, Cout, Cin]       weight-stationary
        # y_ref : [Cout, tr, w_out]        pre-norm conv output row-tile
        # sum/sq: [Cout, w_out]            per-(n, half, c) running partials
        hh = pl.program_id(1)
        tt = pl.program_id(2)
        row0 = (hh * n_rt_in + tt) * tr                    # output-row offset

        acc = jnp.zeros((cout, tr * w_out), jnp.float32)
        for i in range(kh):
            base = row0 * stride + i
            if stride == 1:
                rows = x_ref[:, pl.ds(base, tr), :]        # [Cin, tr, w_pad]
            else:
                # TODO(synk): strided halo reads are semantically correct but
                # not exercised by the demo (it runs stride=1 only).
                rows = x_ref[:, pl.ds(base, tr, stride), :]
            for j in range(kw):
                if stride == 1:
                    slab = rows[:, :, j:j + w_out]
                else:
                    slab = lax.slice(rows, (0, 0, j),
                                     (cin, tr, j + (w_out - 1) * stride + 1),
                                     (1, 1, stride))
                acc = acc + jnp.dot(w_ref[i * kw + j],
                                    slab.reshape(cin, tr * w_out),
                                    preferred_element_type=jnp.float32)

        y3 = acc.reshape(cout, tr, w_out)
        y_ref[...] = y3.astype(y_ref.dtype)

        if mask_rows:
            # Padded output rows (>= h_out) still see real input rows via their
            # receptive field; exclude them from the statistics.
            ridx = lax.broadcasted_iota(jnp.int32, (tr, w_out), 0) + row0
            y_st = jnp.where((ridx < h_out)[None, :, :], y3, 0.0)
        else:
            y_st = y3

        s = jnp.sum(y_st, axis=1)                          # [Cout, w_out]
        ss = jnp.sum(y_st * y_st, axis=1)                  # lane-parallel

        @pl.when(tt == 0)
        def _init():
            sum_ref[...] = s
            sq_ref[...] = ss

        @pl.when(tt > 0)
        def _accum():
            sum_ref[...] += s
            sq_ref[...] += ss

    itemsize = jnp.dtype(intermediate_dtype).itemsize
    x_bytes = n * cin * rows_tot * w_pad * 4
    y_bytes = n * cout * h_out_pad * w_out * itemsize
    stat_bytes = 2 * n * n_split * cout * w_out * 4
    cost1 = pl.CostEstimate(
        flops=2 * n * cout * cin * kh * kw * h_out_pad * w_out,
        transcendentals=0,
        bytes_accessed=x_bytes + w_taps.size * 4 + y_bytes + stat_bytes)

    y_pre, s_sum, s_sq = pl.pallas_call(
        conv_stats_kernel,
        grid=grid,
        in_specs=[
            pl.BlockSpec((None, cin, rows_tot, w_pad),
                         lambda nn, hh, tt: (nn, 0, 0, 0)),   # resident / sample
            pl.BlockSpec((kh * kw, cout, cin),
                         lambda nn, hh, tt: (0, 0, 0)),        # weight-stationary
        ],
        out_specs=[
            pl.BlockSpec((None, cout, tr, w_out),
                         lambda nn, hh, tt: (nn, 0, hh * n_rt_in + tt, 0)),
            pl.BlockSpec((None, None, cout, w_out),
                         lambda nn, hh, tt: (nn, hh, 0, 0)),
            pl.BlockSpec((None, None, cout, w_out),
                         lambda nn, hh, tt: (nn, hh, 0, 0)),
        ],
        out_shape=(
            jax.ShapeDtypeStruct((n, cout, h_out_pad, w_out), intermediate_dtype),
            jax.ShapeDtypeStruct((n, n_split, cout, w_out), jnp.float32),
            jax.ShapeDtypeStruct((n, n_split, cout, w_out), jnp.float32),
        ),
        compiler_params=pltpu.CompilerParams(
            dimension_semantics=("parallel", "parallel", "arbitrary"),
            vmem_limit_bytes=vmem_limit),
        cost_estimate=cost1,
    )(x_pad, w_taps)

    # ---- tiny stats glue: lane reduce, BN/IN select, gamma/beta fold --------
    s_sum = jnp.sum(s_sum, axis=(1, 3))                    # [N, Cout]
    s_sq = jnp.sum(s_sq, axis=(1, 3))
    inv_hw = 1.0 / float(hw)
    mu_in = s_sum * inv_hw
    var_in = jnp.maximum(s_sq * inv_hw - mu_in * mu_in, 0.0)
    mu_bn = jnp.sum(s_sum, axis=0) / float(n * hw)
    var_bn = jnp.maximum(jnp.sum(s_sq, axis=0) / float(n * hw) - mu_bn * mu_bn, 0.0)
    # TODO(synk): for very large HW, E[y^2]-E[y]^2 in f32 can cancel; switch to
    # a Welford-style merge of per-tile partials if parity drifts at 512^2.

    is_bn = (jnp.arange(cout) < cb)[None, :]
    mu_sel = jnp.where(is_bn, mu_bn[None, :], mu_in)
    var_sel = jnp.where(is_bn, var_bn[None, :], var_in)

    g_full = jnp.concatenate(
        [gamma_bn.astype(jnp.float32), jnp.ones((cout - cb,), jnp.float32)])
    b_full = jnp.concatenate(
        [beta_bn.astype(jnp.float32), jnp.zeros((cout - cb,), jnp.float32)])

    a = g_full[None, :] * lax.rsqrt(var_sel + _EPS)        # [N, Cout]
    c = b_full[None, :] - mu_sel * a
    a = a[:, :, None, None]
    c = c[:, :, None, None]

    # ------------- Pass 2: folded affine + ReLU (aliased onto y_pre) ---------
    def scale_shift_relu_kernel(y_ref, a_ref, c_ref, o_ref):
        yv = y_ref[...].astype(jnp.float32)
        o_ref[...] = jnp.maximum(yv * a_ref[...] + c_ref[...],
                                 0.0).astype(o_ref.dtype)

    cost2 = pl.CostEstimate(
        flops=3 * n * cout * h_out_pad * w_out,
        transcendentals=0,
        bytes_accessed=y_bytes + n * cout * h_out_pad * w_out * 4
                       + 2 * n * cout * 4)

    alias = ({0: 0}
             if jnp.dtype(intermediate_dtype) == jnp.dtype(jnp.float32) else {})

    out = pl.pallas_call(
        scale_shift_relu_kernel,
        grid=grid,
        in_specs=[
            pl.BlockSpec((None, cout, tr, w_out),
                         lambda nn, hh, tt: (nn, 0, hh * n_rt_in + tt, 0)),
            pl.BlockSpec((None, cout, 1, 1), lambda nn, hh, tt: (nn, 0, 0, 0)),
            pl.BlockSpec((None, cout, 1, 1), lambda nn, hh, tt: (nn, 0, 0, 0)),
        ],
        out_specs=pl.BlockSpec((None, cout, tr, w_out),
                               lambda nn, hh, tt: (nn, 0, hh * n_rt_in + tt, 0)),
        out_shape=jax.ShapeDtypeStruct((n, cout, h_out_pad, w_out), jnp.float32),
        compiler_params=pltpu.CompilerParams(
            dimension_semantics=("parallel", "parallel", "parallel"),
            vmem_limit_bytes=vmem_limit),
        cost_estimate=cost2,
        input_output_aliases=alias,
    )(y_pre, a, c)

    # Already NCHW: just drop the padded output rows.
    return out[:, :, :h_out, :]


def _reference(x_nchw, weight, bias, gamma_bn, beta_bn, *, stride=1, padding=1):
    """Pure-JAX reference mirroring the PyTorch forward (training-mode stats)."""
    eps = _EPS
    y = lax.conv_general_dilated(
        x_nchw.astype(jnp.float32), weight.astype(jnp.float32),
        window_strides=(stride, stride),
        padding=[(padding, padding), (padding, padding)],
        dimension_numbers=("NCHW", "OIHW", "NCHW"))
    y = y + bias.reshape(1, -1, 1, 1)
    cout = y.shape[1]
    cb = cout // 2
    yb, yi = y[:, :cb], y[:, cb:]
    mu = jnp.mean(yb, axis=(0, 2, 3), keepdims=True)
    var = jnp.mean((yb - mu) ** 2, axis=(0, 2, 3), keepdims=True)
    bn = (yb - mu) * lax.rsqrt(var + eps)
    bn = bn * gamma_bn.reshape(1, -1, 1, 1) + beta_bn.reshape(1, -1, 1, 1)
    mu_i = jnp.mean(yi, axis=(2, 3), keepdims=True)
    var_i = jnp.mean((yi - mu_i) ** 2, axis=(2, 3), keepdims=True)
    inn = (yi - mu_i) * lax.rsqrt(var_i + eps)
    return jnp.maximum(jnp.concatenate([bn, inn], axis=1), 0.0)


if __name__ == "__main__":
    # Conv2dIBNormRelu(in=4, out=8, kernel_size=3, stride=1, padding=1)
    N, CIN, H, W = 2, 4, 24, 24
    COUT, KH, KW = 8, 3, 3

    key = jax.random.PRNGKey(0)
    kx, kw_, kb, kg, kbe = jax.random.split(key, 5)
    x = jax.random.normal(kx, (N, CIN, H, W), jnp.float32)
    weight = 0.1 * jax.random.normal(kw_, (COUT, CIN, KH, KW), jnp.float32)
    bias = 0.1 * jax.random.normal(kb, (COUT,), jnp.float32)
    gamma_bn = 1.0 + 0.1 * jax.random.normal(kg, (COUT // 2,), jnp.float32)
    beta_bn = 0.1 * jax.random.normal(kbe, (COUT // 2,), jnp.float32)

    # block_rows=8 so the 24x24 demo exercises multi-tile stat accumulation,
    # the 2-way row split (v7x dual TensorCore), and padded-row masking.
    run = jax.jit(lambda xx, ww, bb, gg, be: conv2d_ibnorm_relu(
        xx, ww, bb, gg, be, stride=1, padding=1, block_rows=8))
    out = jax.block_until_ready(run(x, weight, bias, gamma_bn, beta_bn))

    ref = _reference(x, weight, bias, gamma_bn, beta_bn, stride=1, padding=1)
    assert out.shape == (N, COUT, H, W), out.shape
    err = float(jnp.max(jnp.abs(out - ref)))
    assert jnp.allclose(out, ref, atol=5e-4, rtol=5e-4), err

    print("KERNEL_OK")
</pallas_src>

<mosaic_0001>
module attributes {stable_mosaic.version = 11 : i64} {
  func.func @scale_shift_relu_kernel(%arg0: i32, %arg1: i32, %arg2: i32, %arg3: memref<1x8x8x24xf32, #tpu.memory_space<vmem>>, %arg4: memref<1x8x1x1xf32, #tpu.memory_space<vmem>>, %arg5: memref<1x8x1x1xf32, #tpu.memory_space<vmem>>, %arg6: memref<1x8x8x24xf32, #tpu.memory_space<vmem>>) attributes {dimension_semantics = [#tpu.dimension_semantics<parallel>, #tpu.dimension_semantics<parallel>, #tpu.dimension_semantics<parallel>], iteration_bounds = array<i64: 2, 2, 2>, scalar_prefetch = 0 : i64, scratch_operands = 0 : i64, tpu.core_type = #tpu.core_type<tc>, window_params = [{transform_indices = @transform_0, window_bounds = array<i64: 1, 8, 8, 24>}, {transform_indices = @transform_1, window_bounds = array<i64: 1, 8, 1, 1>}, {transform_indices = @transform_2, window_bounds = array<i64: 1, 8, 1, 1>}, {transform_indices = @transform_3, window_bounds = array<i64: 1, 8, 8, 24>}]} {
    %c0 = arith.constant 0 : index
    %c0_0 = arith.constant 0 : index
    %c0_1 = arith.constant 0 : index
    %c0_2 = arith.constant 0 : index
    %0 = vector.load %arg3[%c0, %c0_0, %c0_1, %c0_2] : memref<1x8x8x24xf32, #tpu.memory_space<vmem>>, vector<1x8x8x24xf32>
    %1 = vector.shape_cast %0 : vector<1x8x8x24xf32> to vector<8x8x24xf32>
    %c0_3 = arith.constant 0 : index
    %c0_4 = arith.constant 0 : index
    %c0_5 = arith.constant 0 : index
    %c0_6 = arith.constant 0 : index
    %2 = vector.load %arg4[%c0_3, %c0_4, %c0_5, %c0_6] : memref<1x8x1x1xf32, #tpu.memory_space<vmem>>, vector<1x8x1x1xf32>
    %3 = vector.shape_cast %2 : vector<1x8x1x1xf32> to vector<8x1x1xf32>
    %4 = vector.broadcast %3 : vector<8x1x1xf32> to vector<8x8x24xf32>
    %5 = arith.mulf %1, %4 : vector<8x8x24xf32>
    %c0_7 = arith.constant 0 : index
    %c0_8 = arith.constant 0 : index
    %c0_9 = arith.constant 0 : index
    %c0_10 = arith.constant 0 : index
    %6 = vector.load %arg5[%c0_7, %c0_8, %c0_9, %c0_10] : memref<1x8x1x1xf32, #tpu.memory_space<vmem>>, vector<1x8x1x1xf32>
    %7 = vector.shape_cast %6 : vector<1x8x1x1xf32> to vector<8x1x1xf32>
    %8 = vector.broadcast %7 : vector<8x1x1xf32> to vector<8x8x24xf32>
    %9 = arith.addf %5, %8 : vector<8x8x24xf32>
    %cst = arith.constant 0.000000e+00 : f32
    %10 = vector.broadcast %cst : f32 to vector<8x8x24xf32>
    %11 = arith.maximumf %9, %10 : vector<8x8x24xf32>
    %c0_11 = arith.constant 0 : index
    %c0_12 = arith.constant 0 : index
    %c0_13 = arith.constant 0 : index
    %c0_14 = arith.constant 0 : index
    %12 = vector.load %arg6[%c0_11, %c0_12, %c0_13, %c0_14] : memref<1x8x8x24xf32, #tpu.memory_space<vmem>>, vector<1x8x8x24xf32>
    %13 = vector.shape_cast %12 : vector<1x8x8x24xf32> to vector<8x8x24xf32>
    %14 = vector.shape_cast %11 : vector<8x8x24xf32> to vector<1x8x8x24xf32>
    tpu.vector_store %arg6[%c0_11, %c0_12, %c0_13, %c0_14], %14 {strides = array<i32>} : memref<1x8x8x24xf32, #tpu.memory_space<vmem>>, vector<1x8x8x24xf32>,
    return
  }
  func.func @transform_0(%arg0: i32, %arg1: i32, %arg2: i32) -> (i32, i32, i32, i32) {
    %c2_i32 = arith.constant 2 : i32
    %0 = arith.muli %arg1, %c2_i32 : i32
    %1 = arith.addi %0, %arg2 : i32
    %c0_i32 = arith.constant 0 : i32
    %c0_i32_0 = arith.constant 0 : i32
    %c0_i32_1 = arith.constant 0 : i32
    return %arg0, %c0_i32, %1, %c0_i32_0 : i32, i32, i32, i32
  }
  func.func @transform_1(%arg0: i32, %arg1: i32, %arg2: i32) -> (i32, i32, i32, i32) {
    %c0_i32 = arith.constant 0 : i32
    %c0_i32_0 = arith.constant 0 : i32
    %c0_i32_1 = arith.constant 0 : i32
    %c0_i32_2 = arith.constant 0 : i32
    return %arg0, %c0_i32, %c0_i32_0, %c0_i32_1 : i32, i32, i32, i32
  }
  func.func @transform_2(%arg0: i32, %arg1: i32, %arg2: i32) -> (i32, i32, i32, i32) {
    %c0_i32 = arith.constant 0 : i32
    %c0_i32_0 = arith.constant 0 : i32
    %c0_i32_1 = arith.constant 0 : i32
    %c0_i32_2 = arith.constant 0 : i32
    return %arg0, %c0_i32, %c0_i32_0, %c0_i32_1 : i32, i32, i32, i32
  }
  func.func @transform_3(%arg0: i32, %arg1: i32, %arg2: i32) -> (i32, i32, i32, i32) {
    %c2_i32 = arith.constant 2 : i32
    %0 = arith.muli %arg1, %c2_i32 : i32
    %1 = arith.addi %0, %arg2 : i32
    %c0_i32 = arith.constant 0 : i32
    %c0_i32_0 = arith.constant 0 : i32
    %c0_i32_1 = arith.constant 0 : i32
    return %arg0, %c0_i32, %1, %c0_i32_0 : i32, i32, i32, i32
  }
}

module attributes {stable_mosaic.version = 11 : i64} {
  func.func @conv_stats_kernel(%arg0: i32, %arg1: i32, %arg2: i32, %arg3: memref<1x4x34x26xf32, #tpu.memory_space<vmem>>, %arg4: memref<9x8x4xf32, #tpu.memory_space<vmem>>, %arg5: memref<1x8x8x24xf32, #tpu.memory_space<vmem>>, %arg6: memref<1x1x8x24xf32, #tpu.memory_space<vmem>>, %arg7: memref<1x1x8x24xf32, #tpu.memory_space<vmem>>) attributes {dimension_semantics = [#tpu.dimension_semantics<parallel>, #tpu.dimension_semantics<parallel>, #tpu.dimension_semantics<arbitrary>], iteration_bounds = array<i64: 2, 2, 2>, scalar_prefetch = 0 : i64, scratch_operands = 0 : i64, tpu.core_type = #tpu.core_type<tc>, window_params = [{transform_indices = @transform_0, window_bounds = array<i64: 1, 4, 34, 26>}, {pipeline_mode = #tpu.pipeline_mode<synchronous>, transform_indices = @transform_1, window_bounds = array<i64: 9, 8, 4>}, {transform_indices = @transform_2, window_bounds = array<i64: 1, 8, 8, 24>}, {transform_indices = @transform_3, window_bounds = array<i64: 1, 1, 8, 24>}, {transform_indices = @transform_4, window_bounds = array<i64: 1, 1, 8, 24>}]} {
    %c2_i32 = arith.constant 2 : i32
    %0 = arith.muli %arg1, %c2_i32 : i32
    %1 = arith.addi %0, %arg2 : i32
    %c8_i32 = arith.constant 8 : i32
    %2 = arith.muli %1, %c8_i32 : i32
    %cst = arith.constant 0.000000e+00 : f32
    %3 = vector.broadcast %cst : f32 to vector<8x192xf32>
    %c1_i32 = arith.constant 1 : i32
    %4 = arith.muli %2, %c1_i32 : i32
    %c0_i32 = arith.constant 0 : i32
    %5 = arith.addi %4, %c0_i32 : i32
    %c0 = arith.constant 0 : index
    %c0_0 = arith.constant 0 : index
    %6 = arith.index_cast %5 : i32 to index
    %c0_1 = arith.constant 0 : index
    %7 = vector.load %arg3[%c0, %c0_0, %6, %c0_1] : memref<1x4x34x26xf32, #tpu.memory_space<vmem>>, vector<1x4x8x26xf32>
    %8 = vector.shape_cast %7 : vector<1x4x8x26xf32> to vector<4x8x26xf32>
    %9 = vector.extract_strided_slice %8 {offsets = [0, 0, 0], sizes = [4, 8, 24], strides = [1, 1, 1]} : vector<4x8x26xf32> to vector<4x8x24xf32>
    %c0_2 = arith.constant 0 : index
    %c0_3 = arith.constant 0 : index
    %c0_4 = arith.constant 0 : index
    %10 = vector.load %arg4[%c0_2, %c0_3, %c0_4] : memref<9x8x4xf32, #tpu.memory_space<vmem>>, vector<1x8x4xf32>
    %11 = vector.shape_cast %10 : vector<1x8x4xf32> to vector<8x4xf32>
    %12 = vector.shape_cast %9 : vector<4x8x24xf32> to vector<4x192xf32>
    %cst_5 = arith.constant dense<0.000000e+00> : vector<8x192xf32>
    %13 = tpu.matmul %11, %12, %cst_5 {dimension_numbers = #tpu.dot_dimension_numbers<[1], [0], [0], [1], [0, 0, 1, 1], [], []>} : vector<8x4xf32>, vector<4x192xf32>, vector<8x192xf32> -> vector<8x192xf32>
    %14 = arith.addf %3, %13 : vector<8x192xf32>
    %15 = vector.extract_strided_slice %8 {offsets = [0, 0, 1], sizes = [4, 8, 24], strides = [1, 1, 1]} : vector<4x8x26xf32> to vector<4x8x24xf32>
    %c1 = arith.constant 1 : index
    %c0_6 = arith.constant 0 : index
    %c0_7 = arith.constant 0 : index
    %16 = vector.load %arg4[%c1, %c0_6, %c0_7] : memref<9x8x4xf32, #tpu.memory_space<vmem>>, vector<1x8x4xf32>
    %17 = vector.shape_cast %16 : vector<1x8x4xf32> to vector<8x4xf32>
    %18 = vector.shape_cast %15 : vector<4x8x24xf32> to vector<4x192xf32>
    %cst_8 = arith.constant dense<0.000000e+00> : vector<8x192xf32>
    %19 = tpu.matmul %17, %18, %cst_8 {dimension_numbers = #tpu.dot_dimension_numbers<[1], [0], [0], [1], [0, 0, 1, 1], [], []>} : vector<8x4xf32>, vector<4x192xf32>, vector<8x192xf32> -> vector<8x192xf32>
    %20 = arith.addf %14, %19 : vector<8x192xf32>
    %21 = vector.extract_strided_slice %8 {offsets = [0, 0, 2], sizes = [4, 8, 24], strides = [1, 1, 1]} : vector<4x8x26xf32> to vector<4x8x24xf32>
    %c2 = arith.constant 2 : index
    %c0_9 = arith.constant 0 : index
    %c0_10 = arith.constant 0 : index
    %22 = vector.load %arg4[%c2, %c0_9, %c0_10] : memref<9x8x4xf32, #tpu.memory_space<vmem>>, vector<1x8x4xf32>
    %23 = vector.shape_cast %22 : vector<1x8x4xf32> to vector<8x4xf32>
    %24 = vector.shape_cast %21 : vector<4x8x24xf32> to vector<4x192xf32>
    %cst_11 = arith.constant dense<0.000000e+00> : vector<8x192xf32>
    %25 = tpu.matmul %23, %24, %cst_11 {dimension_numbers = #tpu.dot_dimension_numbers<[1], [0], [0], [1], [0, 0, 1, 1], [], []>} : vector<8x4xf32>, vector<4x192xf32>, vector<8x192xf32> -> vector<8x192xf32>
    %26 = arith.addf %20, %25 : vector<8x192xf32>
    %c1_i32_12 = arith.constant 1 : i32
    %27 = arith.muli %2, %c1_i32_12 : i32
    %c1_i32_13 = arith.constant 1 : i32
    %28 = arith.addi %27, %c1_i32_13 : i32
    %c0_14 = arith.constant 0 : index
    %c0_15 = arith.constant 0 : index
    %29 = arith.index_cast %28 : i32 to index
    %c0_16 = arith.constant 0 : index
    %30 = vector.load %arg3[%c0_14, %c0_15, %29, %c0_16] : memref<1x4x34x26xf32, #tpu.memory_space<vmem>>, vector<1x4x8x26xf32>
    %31 = vector.shape_cast %30 : vector<1x4x8x26xf32> to vector<4x8x26xf32>
    %32 = vector.extract_strided_slice %31 {offsets = [0, 0, 0], sizes = [4, 8, 24], strides = [1, 1, 1]} : vector<4x8x26xf32> to vector<4x8x24xf32>
    %c3 = arith.constant 3 : index
    %c0_17 = arith.constant 0 : index
    %c0_18 = arith.constant 0 : index
    %33 = vector.load %arg4[%c3, %c0_17, %c0_18] : memref<9x8x4xf32, #tpu.memory_space<vmem>>, vector<1x8x4xf32>
    %34 = vector.shape_cast %33 : vector<1x8x4xf32> to vector<8x4xf32>
    %35 = vector.shape_cast %32 : vector<4x8x24xf32> to vector<4x192xf32>
    %cst_19 = arith.constant dense<0.000000e+00> : vector<8x192xf32>
    %36 = tpu.matmul %34, %35, %cst_19 {dimension_numbers = #tpu.dot_dimension_numbers<[1], [0], [0], [1], [0, 0, 1, 1], [], []>} : vector<8x4xf32>, vector<4x192xf32>, vector<8x192xf32> -> vector<8x192xf32>
    %37 = arith.addf %26, %36 : vector<8x192xf32>
    %38 = vector.extract_strided_slice %31 {offsets = [0, 0, 1], sizes = [4, 8, 24], strides = [1, 1, 1]} : vector<4x8x26xf32> to vector<4x8x24xf32>
    %c4 = arith.constant 4 : index
    %c0_20 = arith.constant 0 : index
    %c0_21 = arith.constant 0 : index
    %39 = vector.load %arg4[%c4, %c0_20, %c0_21] : memref<9x8x4xf32, #tpu.memory_space<vmem>>, vector<1x8x4xf32>
    %40 = vector.shape_cast %39 : vector<1x8x4xf32> to vector<8x4xf32>
    %41 = vector.shape_cast %38 : vector<4x8x24xf32> to vector<4x192xf32>
    %cst_22 = arith.constant dense<0.000000e+00> : vector<8x192xf32>
    %42 = tpu.matmul %40, %41, %cst_22 {dimension_numbers = #tpu.dot_dimension_numbers<[1], [0], [0], [1], [0, 0, 1, 1], [], []>} : vector<8x4xf32>, vector<4x192xf32>, vector<8x192xf32> -> vector<8x192xf32>
    %43 = arith.addf %37, %42 : vector<8x192xf32>
    %44 = vector.extract_strided_slice %31 {offsets = [0, 0, 2], sizes = [4, 8, 24], strides = [1, 1, 1]} : vector<4x8x26xf32> to vector<4x8x24xf32>
    %c5 = arith.constant 5 : index
    %c0_23 = arith.constant 0 : index
    %c0_24 = arith.constant 0 : index
    %45 = vector.load %arg4[%c5, %c0_23, %c0_24] : memref<9x8x4xf32, #tpu.memory_space<vmem>>, vector<1x8x4xf32>
    %46 = vector.shape_cast %45 : vector<1x8x4xf32> to vector<8x4xf32>
    %47 = vector.shape_cast %44 : vector<4x8x24xf32> to vector<4x192xf32>
    %cst_25 = arith.constant dense<0.000000e+00> : vector<8x192xf32>
    %48 = tpu.matmul %46, %47, %cst_25 {dimension_numbers = #tpu.dot_dimension_numbers<[1], [0], [0], [1], [0, 0, 1, 1], [], []>} : vector<8x4xf32>, vector<4x192xf32>, vector<8x192xf32> -> vector<8x192xf32>
    %49 = arith.addf %43, %48 : vector<8x192xf32>
    %c1_i32_26 = arith.constant 1 : i32
    %50 = arith.muli %2, %c1_i32_26 : i32
    %c2_i32_27 = arith.constant 2 : i32
    %51 = arith.addi %50, %c2_i32_27 : i32
    %c0_28 = arith.constant 0 : index
    %c0_29 = arith.constant 0 : index
    %52 = arith.index_cast %51 : i32 to index
    %c0_30 = arith.constant 0 : index
    %53 = vector.load %arg3[%c0_28, %c0_29, %52, %c0_30] : memref<1x4x34x26xf32, #tpu.memory_space<vmem>>, vector<1x4x8x26xf32>
    %54 = vector.shape_cast %53 : vector<1x4x8x26xf32> to vector<4x8x26xf32>
    %55 = vector.extract_strided_slice %54 {offsets = [0, 0, 0], sizes = [4, 8, 24], strides = [1, 1, 1]} : vector<4x8x26xf32> to vector<4x8x24xf32>
    %c6 = arith.constant 6 : index
    %c0_31 = arith.constant 0 : index
    %c0_32 = arith.constant 0 : index
    %56 = vector.load %arg4[%c6, %c0_31, %c0_32] : memref<9x8x4xf32, #tpu.memory_space<vmem>>, vector<1x8x4xf32>
    %57 = vector.shape_cast %56 : vector<1x8x4xf32> to vector<8x4xf32>
    %58 = vector.shape_cast %55 : vector<4x8x24xf32> to vector<4x192xf32>
    %cst_33 = arith.constant dense<0.000000e+00> : vector<8x192xf32>
    %59 = tpu.matmul %57, %58, %cst_33 {dimension_numbers = #tpu.dot_dimension_numbers<[1], [0], [0], [1], [0, 0, 1, 1], [], []>} : vector<8x4xf32>, vector<4x192xf32>, vector<8x192xf32> -> vector<8x192xf32>
    %60 = arith.addf %49, %59 : vector<8x192xf32>
    %61 = vector.extract_strided_slice %54 {offsets = [0, 0, 1], sizes = [4, 8, 24], strides = [1, 1, 1]} : vector<4x8x26xf32> to vector<4x8x24xf32>
    %c7 = arith.constant 7 : index
    %c0_34 = arith.constant 0 : index
    %c0_35 = arith.constant 0 : index
    %62 = vector.load %arg4[%c7, %c0_34, %c0_35] : memref<9x8x4xf32, #tpu.memory_space<vmem>>, vector<1x8x4xf32>
    %63 = vector.shape_cast %62 : vector<1x8x4xf32> to vector<8x4xf32>
    %64 = vector.shape_cast %61 : vector<4x8x24xf32> to vector<4x192xf32>
    %cst_36 = arith.constant dense<0.000000e+00> : vector<8x192xf32>
    %65 = tpu.matmul %63, %64, %cst_36 {dimension_numbers = #tpu.dot_dimension_numbers<[1], [0], [0], [1], [0, 0, 1, 1], [], []>} : vector<8x4xf32>, vector<4x192xf32>, vector<8x192xf32> -> vector<8x192xf32>
    %66 = arith.addf %60, %65 : vector<8x192xf32>
    %67 = vector.extract_strided_slice %54 {offsets = [0, 0, 2], sizes = [4, 8, 24], strides = [1, 1, 1]} : vector<4x8x26xf32> to vector<4x8x24xf32>
    %c8 = arith.constant 8 : index
    %c0_37 = arith.constant 0 : index
    %c0_38 = arith.constant 0 : index
    %68 = vector.load %arg4[%c8, %c0_37, %c0_38] : memref<9x8x4xf32, #tpu.memory_space<vmem>>, vector<1x8x4xf32>
    %69 = vector.shape_cast %68 : vector<1x8x4xf32> to vector<8x4xf32>
    %70 = vector.shape_cast %67 : vector<4x8x24xf32> to vector<4x192xf32>
    %cst_39 = arith.constant dense<0.000000e+00> : vector<8x192xf32>
    %71 = tpu.matmul %69, %70, %cst_39 {dimension_numbers = #tpu.dot_dimension_numbers<[1], [0], [0], [1], [0, 0, 1, 1], [], []>} : vector<8x4xf32>, vector<4x192xf32>, vector<8x192xf32> -> vector<8x192xf32>
    %72 = arith.addf %66, %71 : vector<8x192xf32>
    %73 = vector.shape_cast %72 : vector<8x192xf32> to vector<8x8x24xf32>
    %c0_40 = arith.constant 0 : index
    %c0_41 = arith.constant 0 : index
    %c0_42 = arith.constant 0 : index
    %c0_43 = arith.constant 0 : index
    %74 = vector.load %arg5[%c0_40, %c0_41, %c0_42, %c0_43] : memref<1x8x8x24xf32, #tpu.memory_space<vmem>>, vector<1x8x8x24xf32>
    %75 = vector.shape_cast %74 : vector<1x8x8x24xf32> to vector<8x8x24xf32>
    %76 = vector.shape_cast %73 : vector<8x8x24xf32> to vector<1x8x8x24xf32>
    tpu.vector_store %arg5[%c0_40, %c0_41, %c0_42, %c0_43], %76 {strides = array<i32>} : memref<1x8x8x24xf32, #tpu.memory_space<vmem>>, vector<1x8x8x24xf32>,
    %77 = tpu.iota {dimensions = array<i32: 0>} : vector<8x24xi32>
    %78 = vector.broadcast %2 : i32 to vector<8x24xi32>
    %79 = arith.addi %77, %78 : vector<8x24xi32>
    %c24_i32 = arith.constant 24 : i32
    %80 = vector.broadcast %c24_i32 : i32 to vector<8x24xi32>
    %81 = arith.cmpi slt, %79, %80 : vector<8x24xi32>
    %82 = vector.shape_cast %81 : vector<8x24xi1> to vector<1x8x24xi1>
    %cst_44 = arith.constant 0.000000e+00 : f32
    %83 = vector.shape_cast %82 : vector<1x8x24xi1> to vector<1x8x24xi1>
    %84 = vector.broadcast %83 : vector<1x8x24xi1> to vector<8x8x24xi1>
    %85 = vector.broadcast %cst_44 : f32 to vector<8x8x24xf32>
    %86 = arith.select %84, %73, %85 : vector<8x8x24xi1>, vector<8x8x24xf32>
    %cst_45 = arith.constant dense<0.000000e+00> : vector<8x24xf32>
    %87 = vector.multi_reduction <add>, %86, %cst_45 [1] : vector<8x8x24xf32> to vector<8x24xf32>
    %88 = arith.mulf %86, %86 : vector<8x8x24xf32>
    %cst_46 = arith.constant dense<0.000000e+00> : vector<8x24xf32>
    %89 = vector.multi_reduction <add>, %88, %cst_46 [1] : vector<8x8x24xf32> to vector<8x24xf32>
    %c0_i32_47 = arith.constant 0 : i32
    %90 = arith.cmpi eq, %arg2, %c0_i32_47 : i32
    %91 = arith.extui %90 : i1 to i32
    %c0_i32_48 = arith.constant 0 : i32
    %92 = arith.cmpi ne, %91, %c0_i32_48 : i32
    scf.if %92 {
      %c0_51 = arith.constant 0 : index
      %c0_52 = arith.constant 0 : index
      %c0_53 = arith.constant 0 : index
      %c0_54 = arith.constant 0 : index
      %96 = vector.load %arg6[%c0_51, %c0_52, %c0_53, %c0_54] : memref<1x1x8x24xf32, #tpu.memory_space<vmem>>, vector<1x1x8x24xf32>
      %97 = vector.shape_cast %96 : vector<1x1x8x24xf32> to vector<8x24xf32>
      %98 = vector.shape_cast %87 : vector<8x24xf32> to vector<1x1x8x24xf32>
      tpu.vector_store %arg6[%c0_51, %c0_52, %c0_53, %c0_54], %98 {strides = array<i32>} : memref<1x1x8x24xf32, #tpu.memory_space<vmem>>, vector<1x1x8x24xf32>,
      %c0_55 = arith.constant 0 : index
      %c0_56 = arith.constant 0 : index
      %c0_57 = arith.constant 0 : index
      %c0_58 = arith.constant 0 : index
      %99 = vector.load %arg7[%c0_55, %c0_56, %c0_57, %c0_58] : memref<1x1x8x24xf32, #tpu.memory_space<vmem>>, vector<1x1x8x24xf32>
      %100 = vector.shape_cast %99 : vector<1x1x8x24xf32> to vector<8x24xf32>
      %101 = vector.shape_cast %89 : vector<8x24xf32> to vector<1x1x8x24xf32>
      tpu.vector_store %arg7[%c0_55, %c0_56, %c0_57, %c0_58], %101 {strides = array<i32>} : memref<1x1x8x24xf32, #tpu.memory_space<vmem>>, vector<1x1x8x24xf32>,
    } else {
    }
    %c0_i32_49 = arith.constant 0 : i32
    %93 = arith.cmpi sgt, %arg2, %c0_i32_49 : i32
    %94 = arith.extui %93 : i1 to i32
    %c0_i32_50 = arith.constant 0 : i32
    %95 = arith.cmpi ne, %94, %c0_i32_50 : i32
    scf.if %95 {
      %c0_51 = arith.constant 0 : index
      %c0_52 = arith.constant 0 : index
      %c0_53 = arith.constant 0 : index
      %c0_54 = arith.constant 0 : index
      %96 = vector.load %arg6[%c0_51, %c0_52, %c0_53, %c0_54] : memref<1x1x8x24xf32, #tpu.memory_space<vmem>>, vector<1x1x8x24xf32>
      %97 = vector.shape_cast %96 : vector<1x1x8x24xf32> to vector<8x24xf32>
      %98 = arith.addf %97, %87 : vector<8x24xf32>
      %c0_55 = arith.constant 0 : index
      %c0_56 = arith.constant 0 : index
      %c0_57 = arith.constant 0 : index
      %c0_58 = arith.constant 0 : index
      %99 = vector.load %arg6[%c0_55, %c0_56, %c0_57, %c0_58] : memref<1x1x8x24xf32, #tpu.memory_space<vmem>>, vector<1x1x8x24xf32>
      %100 = vector.shape_cast %99 : vector<1x1x8x24xf32> to vector<8x24xf32>
      %101 = vector.shape_cast %98 : vector<8x24xf32> to vector<1x1x8x24xf32>
      tpu.vector_store %arg6[%c0_55, %c0_56, %c0_57, %c0_58], %101 {strides = array<i32>} : memref<1x1x8x24xf32, #tpu.memory_space<vmem>>, vector<1x1x8x24xf32>,
      %c0_59 = arith.constant 0 : index
      %c0_60 = arith.constant 0 : index
      %c0_61 = arith.constant 0 : index
      %c0_62 = arith.constant 0 : index
      %102 = vector.load %arg7[%c0_59, %c0_60, %c0_61, %c0_62] : memref<1x1x8x24xf32, #tpu.memory_space<vmem>>, vector<1x1x8x24xf32>
      %103 = vector.shape_cast %102 : vector<1x1x8x24xf32> to vector<8x24xf32>
      %104 = arith.addf %103, %89 : vector<8x24xf32>
      %c0_63 = arith.constant 0 : index
      %c0_64 = arith.constant 0 : index
      %c0_65 = arith.constant 0 : index
      %c0_66 = arith.constant 0 : index
      %105 = vector.load %arg7[%c0_63, %c0_64, %c0_65, %c0_66] : memref<1x1x8x24xf32, #tpu.memory_space<vmem>>, vector<1x1x8x24xf32>
      %106 = vector.shape_cast %105 : vector<1x1x8x24xf32> to vector<8x24xf32>
      %107 = vector.shape_cast %104 : vector<8x24xf32> to vector<1x1x8x24xf32>
      tpu.vector_store %arg7[%c0_63, %c0_64, %c0_65, %c0_66], %107 {strides = array<i32>} : memref<1x1x8x24xf32, #tpu.memory_space<vmem>>, vector<1x1x8x24xf32>,
    } else {
    }
    return
  }
  func.func @transform_0(%arg0: i32, %arg1: i32, %arg2: i32) -> (i32, i32, i32, i32) {
    %c0_i32 = arith.constant 0 : i32
    %c0_i32_0 = arith.constant 0 : i32
    %c0_i32_1 = arith.constant 0 : i32
    %c0_i32_2 = arith.constant 0 : i32
    return %arg0, %c0_i32, %c0_i32_0, %c0_i32_1 : i32, i32, i32, i32
  }
  func.func @transform_1(%arg0: i32, %arg1: i32, %arg2: i32) -> (i32, i32, i32) {
    %c0_i32 = arith.constant 0 : i32
    %c0_i32_0 = arith.constant 0 : i32
    %c0_i32_1 = arith.constant 0 : i32
    %c0_i32_2 = arith.constant 0 : i32
    return %c0_i32, %c0_i32_0, %c0_i32_1 : i32, i32, i32
  }
  func.func @transform_2(%arg0: i32, %arg1: i32, %arg2: i32) -> (i32, i32, i32, i32) {
    %c2_i32 = arith.constant 2 : i32
    %0 = arith.muli %arg1, %c2_i32 : i32
    %1 = arith.addi %0, %arg2 : i32
    %c0_i32 = arith.constant 0 : i32
    %c0_i32_0 = arith.constant 0 : i32
    %c0_i32_1 = arith.constant 0 : i32
    return %arg0, %c0_i32, %1, %c0_i32_0 : i32, i32, i32, i32
  }
  func.func @transform_3(%arg0: i32, %arg1: i32, %arg2: i32) -> (i32, i32, i32, i32) {
    %c0_i32 = arith.constant 0 : i32
    %c0_i32_0 = arith.constant 0 : i32
    %c0_i32_1 = arith.constant 0 : i32
    return %arg0, %arg1, %c0_i32, %c0_i32_0 : i32, i32, i32, i32
  }
  func.func @transform_4(%arg0: i32, %arg1: i32, %arg2: i32) -> (i32, i32, i32, i32) {
    %c0_i32 = arith.constant 0 : i32
    %c0_i32_0 = arith.constant 0 : i32
    %c0_i32_1 = arith.constant 0 : i32
    return %arg0, %arg1, %c0_i32, %c0_i32_0 : i32, i32, i32, i32
  }
}

</mosaic_0001>

<bundles_post_ra>
// kernel: _lambda_.3
= control target key start
LH: loop header
LB: loop body
LE: loop exit
PB: predicated region body
PF: predicated region fallthrough
CT: control target
= control target key end

     0   :  { %s887_s12 = smov 0   ;;  %s889_s13 = smov 0   ;;  %s1049_s0 = inlined_call_operand.vmem [shape: f32[2,8,32,24], index: 0, kind: input, shape index: {}, may-alias: {0,3}]   ;;  %s1050_s1 = inlined_call_operand.vmem [shape: f32[2,8,1,1], index: 1, kind: input, shape index: {}]   ;;  %s1051_s2 = inlined_call_operand.vmem [shape: f32[2,8,1,1], index: 2, kind: input, shape index: {}]   ;;  %s1052_s3 = inlined_call_operand.vmem [shape: f32[2,8,32,24], index: 3, kind: output, shape index: {}, may-alias: {0,3}]  }
   0x1   :  { %s891_s14 = smov 0   ;;  %s893_s15 = smov 0  }
   0x2   :  { %s895_s16 = smov 0   ;;  %s897_s17 = smov 0  }
   0x3   :  { %s899_s18 = smov 0   ;;  %s901_s19 = smov 0  }
   0x4   :  { %s903_s20 = smov 0  }
   0x5 LB: > { %s25_s21 = sadd.s32 1, %s852_s17  ;;  %s28_s22 = sadd.s32 1, %s856_s18  ;;  %s864_s20 = sphi %s903_s20, %s13_s20   ;;  %s860_s19 = sphi %s901_s19, %s1061_s19   ;;  %s856_s18 = sphi %s899_s18, %s1060_s18   ;;  %s852_s17 = sphi %s897_s17, %s1059_s17   ;;  %s848_s16 = sphi %s895_s16, %s1058_s16   ;;  %s844_s15 = sphi %s893_s15, %s1057_s15   ;;  %s840_s14 = sphi %s891_s14, %s1056_s14   ;;  %s836_s13 = sphi %s889_s13, %s1055_s13   ;;  %s832_s12 = sphi %s887_s12, %s1054_s12  }
   0x6   : > { %p26_p0 = scmp.ge.s32.totalorder %s25_s21, 2  ;;  %s680_s23 = sadd.s32 4294967295, %s864_s20  }
   0x7   : > { %s682_s24 = sshll.u32 %s856_s18, 1  ;;  %s32_s25 = sadd.s32 1, %s860_s19 }
   0x8   : > { %s1063_s21 = smov (%p26_p0, %s25_s21), 0  ;;  %s1065_s22 = smov (!%p26_p0, %s28_s22), %s856_s18 }
   0x9   : > { %s37_s26 = sadd.s32 %s852_s17, %s682_s24  ;;  %p30_p1 = scmp.ge.s32.totalorder %s1065_s22, 2 }
   0xa   : > { %p52_p2 = scmp.ne.s32.totalorder %s836_s13, %s832_s12  ;;  %p53_p3 = scmp.eq.s32.totalorder %s864_s20, 0 }
   0xb   : > { %p140_p4 = scmp.eq.s32.totalorder %s680_s23, 7  ;;  %s1067_s22 = smov (%p30_p1, %s1065_s22), 0 }
   0xc   : > { %s1069_s25 = smov (!%p30_p1, %s32_s25), %s860_s19  ;;  %s683_s27 = sshll.u32 %s1067_s22, 1 }
   0xd   : > { %p54_p5 = por %p53_p3, %p52_p2  ;;  %p34_p6 = scmp.ge.s32.totalorder %s1069_s25, 2 }
   0xe   : > { %s39_s28 = sadd.s32 %s683_s27, %s1063_s21  ;;  %p949_p7 = por %p140_p4, %p52_p2 }
   0xf   : > { %s41_s29 = ssub.s32 %s37_s26, %s39_s28  ;;  %s1071_s25 = smov (%p34_p6, %s1069_s25), 0 }
  0x10   : > { %s40_s4 = ssub.s32 %s860_s19, %s1071_s25  ;;  %s45_s6 = sadd.s32 1, %s836_s13 }
  0x11   : > { %s42_s5 = sor.u32 %s41_s29, %s40_s4  ;;  %p687_p9 = scmp.ge.s32.totalorder %s864_s20, 8 }
  0x12   : > { %p43_p8 = scmp.eq.s32.totalorder %s42_s5, 0 }
  0x13   : > { %162 = sbr.rel (%p687_p9) target bundleno = 40 (0x28), region = 16 }
  0x14   : > { %s959_s7 = scalar_select %p43_p8, %s836_s13, %s45_s6  }
  0x1a   : > { %165 = sbr.rel (!%p54_p5) target bundleno = 40 (0x28), region = 20  ;;  %s167_s8 = sand.u32 (%p54_p5), 1, %s836_s13  }
  0x1b   : > { %s690_s9 = sshll.u32 (%p54_p5), %s860_s19, 5  ;;  %s688_s10 = sshll.u32 (%p54_p5), %s167_s8, 6 }
  0x1c   : > { %s173_s11 = sadd.s32 (%p54_p5), %s690_s9, %s37_s26  ;;  %s169_s29 = scalar_lea.vmem (%p54_p5), [#allocation2], %s688_s10 }
  0x1d   : > { %s691_s23 = sshll.u32 (%p54_p5), %s173_s11, 3 }
  0x1e   : > { %s175_s28 = scalar_lea.vmem (%p54_p5), %s1049_s0, %s691_s23 }
  0x1f   : > { %v217_v0 = vld [vmem:[%s175_s28] sm:$0xff] (%p54_p5) }
  0x20   : > { %v219_v1 = vld [vmem:[%s175_s28 + $0x20] sm:$0xff] (%p54_p5)  ;;  %218 = vst [vmem:[%s169_s29] sm:$0xff] (%p54_p5), %v217_v0 }
  0x21   : > { %v221_v2 = vld [vmem:[%s175_s28 + $0x40] sm:$0xff]  ;;  %220 = vst [vmem:[%s169_s29 + $0x8] sm:$0xff] %v219_v1 }
  0x22   : > { %222 = vst [vmem:[%s169_s29 + $0x10] sm:$0xff] %v221_v2  ;;  %v223_v3 = vld [vmem:[%s175_s28 + $0x60] sm:$0xff] }
  0x23   : > { %v225_v4 = vld [vmem:[%s175_s28 + $0x80] sm:$0xff]  ;;  %224 = vst [vmem:[%s169_s29 + $0x18] sm:$0xff] %v223_v3 }
  0x24   : > { %v227_v5 = vld [vmem:[%s175_s28 + $0xa0] sm:$0xff]  ;;  %226 = vst [vmem:[%s169_s29 + $0x20] sm:$0xff] %v225_v4 }
  0x25   : > { %228 = vst [vmem:[%s169_s29 + $0x28] sm:$0xff] %v227_v5  ;;  %v229_v6 = vld [vmem:[%s175_s28 + $0xc0] sm:$0xff] }
  0x26   : > { %v231_v7 = vld [vmem:[%s175_s28 + $0xe0] sm:$0xff]  ;;  %230 = vst [vmem:[%s169_s29 + $0x30] sm:$0xff] %v229_v6 }
  0x27   : > { %232 = vst [vmem:[%s169_s29 + $0x38] sm:$0xff] %v231_v7 }
  0x28 PF: > { %p692_p10 = scmp.ge.s32.totalorder %s864_s20, 1  ;;  %p251_p11 = scmp.lt.s32.totalorder %s864_s20, 9 }
  0x2a   : > { %p252_p12 = pnand %p692_p10, %p251_p11 }
  0x2b   : > { %p290_p13 = scmp.lt.s32.totalorder (!%p252_p12), %s848_s16, 1  ;;  %v866_v8 = vmov (!%p252_p12), 0   ;;  %s258_s23 = sand.u32 (!%p252_p12), 1, %s832_s12   ;;  %vm492_vm0 = vcmask (!%p252_p12), 195584  }
  0x2c   : > { %255 = sbr.rel (%p252_p12) target bundleno = 225 (0xe1), region = 66  ;;  %793 = vset.pattern.permute.xlu1 (!%p252_p12), %v866_v8  ;;  %792 = vset.pattern.permute.xlu0 (!%p252_p12), %v866_v8  ;;  %s693_s24 = sshll.u32 (!%p252_p12), %s258_s23, 6 }
  0x2d   : > { %s978_s27 = scalar_lea.vmem (!%p252_p12), [#allocation2], %s693_s24  ;;  %s986_s12 = scalar_lea.vmem (!%p252_p12), [#allocation3], %s693_s24 }
  0x2e   : > { %v300_v31 = vld [vmem:[%s978_s27] sm:$0xff] (!%p252_p12)  ;;  %v301_v32 = vld [vmem:[%s978_s27 + $0x8] sm:$0xff] (!%p252_p12)  ;;  %v302_v37 = vld [vmem:[%s978_s27 + $0x10] sm:$0xff] (!%p252_p12) }
  0x2f   : > { %v303_v38 = vld [vmem:[%s978_s27 + $0x18] sm:$0xff] (!%p252_p12)  ;;  %v305_v47 = vld [vmem:[%s978_s27 + $0x28] sm:$0xff] (!%p252_p12)  ;;  %v304_v48 = vld [vmem:[%s978_s27 + $0x20] sm:$0xff] (!%p252_p12) }
  0x30   : > { %v307_v57 = vld [vmem:[%s978_s27 + $0x38] sm:$0xff] (!%p252_p12)  ;;  %v306_v58 = vld [vmem:[%s978_s27 + $0x30] sm:$0xff] (!%p252_p12) }
  0x33   : > { %s291_s26 = scalar_select %p290_p13, %s848_s16, 1 }
  0x34   : > { %s714_s28 = sshll.u32 (%p949_p7), %s844_s15, 1  ;;  %s715_s29 = sshll.u32 (%p949_p7), %s848_s16, 5 }
  0x35   : > { %s695_s4 = sshll.u32 %s291_s26, 3  ;;  %s509_s26 = sadd.s32 (%p949_p7), %s840_s14, %s714_s28 }
  0x36   : > { %s293_s8 = scalar_lea.vmem %s1050_s1, %s695_s4  ;;  %s297_s11 = scalar_lea.vmem %s1051_s2, %s695_s4 }
  0x37   : > { %v699_v9 = vld [vmem:[%s293_s8 + $0x2] ss:$0 sm:$0xff]  ;;  %v697_v10 = vld [vmem:[%s293_s8] ss:$0 sm:$0xff]  ;;  %v700_v11 = vld [vmem:[%s293_s8 + $0x3] ss:$0 sm:$0xff]  ;;  %s511_s30 = sadd.s32 (%p949_p7), %s715_s29, %s509_s26 }
  0x38   : > { %365 = vperm.xlu1 %793, %v699_v9   ;;  %357 = vperm.xlu0 %792, %v697_v10   ;;  %v698_v12 = vld [vmem:[%s293_s8 + $0x1] ss:$0 sm:$0xff]  ;;  %v702_v13 = vld [vmem:[%s293_s8 + $0x5] ss:$0 sm:$0xff]  ;;  %v701_v14 = vld [vmem:[%s293_s8 + $0x4] ss:$0 sm:$0xff] }
  0x39   : > { %v704_v15 = vld [vmem:[%s293_s8 + $0x7] ss:$0 sm:$0xff]  ;;  %v703_v16 = vld [vmem:[%s293_s8 + $0x6] ss:$0 sm:$0xff]  ;;  %v706_v17 = vld [vmem:[%s297_s11 + $0x1] ss:$0 sm:$0xff] }
  0x3a   : > { %v705_v18 = vld [vmem:[%s297_s11] ss:$0 sm:$0xff]  ;;  %v708_v19 = vld [vmem:[%s297_s11 + $0x3] ss:$0 sm:$0xff]  ;;  %v707_v20 = vld [vmem:[%s297_s11 + $0x2] ss:$0 sm:$0xff] }
  0x3b   : > { %v710_v21 = vld [vmem:[%s297_s11 + $0x5] ss:$0 sm:$0xff]  ;;  %v709_v22 = vld [vmem:[%s297_s11 + $0x4] ss:$0 sm:$0xff]  ;;  %v712_v23 = vld [vmem:[%s297_s11 + $0x7] ss:$0 sm:$0xff] }
  0x3c   : > { %369 = vperm.xlu1 %793, %v700_v11   ;;  %361 = vperm.xlu0 %792, %v698_v12   ;;  %v711_v24 = vld [vmem:[%s297_s11 + $0x6] ss:$0 sm:$0xff]  ;;  %s716_s4 = sshll.u32 (%p949_p7), %s511_s30, 3 }
  0x3d   : > { %s513_s8 = scalar_lea.vmem (%p949_p7), %s1052_s3, %s716_s4 }
  0x40   : > { %377 = vperm.xlu1 %793, %v702_v13   ;;  %373 = vperm.xlu0 %792, %v701_v14  }
  0x44   : > { %385 = vperm.xlu1 %793, %v704_v15   ;;  %381 = vperm.xlu0 %792, %v703_v16  }
  0x48   : > { %449 = vperm.xlu1 %793, %v706_v17   ;;  %445 = vperm.xlu0 %792, %v705_v18  }
  0x4c   : > { %457 = vperm.xlu1 %793, %v708_v19   ;;  %453 = vperm.xlu0 %792, %v707_v20  }
  0x50   : > { %465 = vperm.xlu1 %793, %v710_v21   ;;  %461 = vperm.xlu0 %792, %v709_v22  }
  0x54   : > { %473 = vperm.xlu1 %793, %v712_v23   ;;  %469 = vperm.xlu0 %792, %v711_v24  }
  0xb7   : > { %v366_v25 = vpop.permute.xlu1 %365  ;;  %v358_v26 = vpop.permute.xlu0 %357 }
  0xb8   : > { %v388_v35 = vmul.f32 %v358_v26, %v300_v31  ;;  %v390_v43 = vmul.f32 %v366_v25, %v302_v37 }
  0xbb   : > { %v370_v27 = vpop.permute.xlu1 %369  ;;  %v362_v28 = vpop.permute.xlu0 %361 }
  0xbc   : > { %v389_v36 = vmul.f32 %v362_v28, %v301_v32  ;;  %v391_v44 = vmul.f32 %v370_v27, %v303_v38 }
  0xbf   : > { %v378_v29 = vpop.permute.xlu1 %377  ;;  %v374_v30 = vpop.permute.xlu0 %373 }
  0xc0   : > { %v393_v53 = vmul.f32 %v378_v29, %v305_v47  ;;  %v392_v54 = vmul.f32 %v374_v30, %v304_v48 }
  0xc3   : > { %v386_v33 = vpop.permute.xlu1 %385  ;;  %v382_v34 = vpop.permute.xlu0 %381 }
  0xc4   : > { %v395_v63 = vmul.f32 %v386_v33, %v307_v57  ;;  %v394_v0 = vmul.f32 %v382_v34, %v306_v58 }
  0xc7   : > { %v450_v39 = vpop.permute.xlu1 %449  ;;  %v446_v40 = vpop.permute.xlu0 %445 }
  0xc8   : > { %v477_v41 = vadd.f32 %v450_v39, %v389_v36  ;;  %v476_v42 = vadd.f32 %v446_v40, %v388_v35 }
  0xca   : > { %v485_v45 = vmax.f32 %v477_v41, 0.0  ;;  %v484_v46 = vmax.f32 %v476_v42, 0.0 }
  0xcb   : > { %v458_v49 = vpop.permute.xlu1 %457  ;;  %v454_v50 = vpop.permute.xlu0 %453 }
  0xcc   : > { %494 = vst.msk [vmem:[%s986_s12 + $0x8] sm:$0xff] %vm492_vm0, %v485_v45  ;;  %493 = vst.msk [vmem:[%s986_s12] sm:$0xff] %vm492_vm0, %v484_v46  ;;  %v479_v51 = vadd.f32 %v458_v49, %v391_v44  ;;  %v478_v52 = vadd.f32 %v454_v50, %v390_v43 }
  0xce   : > { %v487_v55 = vmax.f32 %v479_v51, 0.0  ;;  %v486_v56 = vmax.f32 %v478_v52, 0.0 }
  0xcf   : > { %v466_v59 = vpop.permute.xlu1 %465  ;;  %v462_v60 = vpop.permute.xlu0 %461 }
  0xd0   : > { %496 = vst.msk [vmem:[%s986_s12 + $0x18] sm:$0xff] %vm492_vm0, %v487_v55  ;;  %495 = vst.msk [vmem:[%s986_s12 + $0x10] sm:$0xff] %vm492_vm0, %v486_v56  ;;  %v481_v61 = vadd.f32 %v466_v59, %v393_v53  ;;  %v480_v62 = vadd.f32 %v462_v60, %v392_v54 }
  0xd2   : > { %v489_v1 = vmax.f32 %v481_v61, 0.0  ;;  %v488_v2 = vmax.f32 %v480_v62, 0.0  ;;  %507 = sbr.rel (!%p949_p7) target bundleno = 225 (0xe1), region = 74 }
  0xd3   : > { %v474_v3 = vpop.permute.xlu1 %473  ;;  %v470_v4 = vpop.permute.xlu0 %469  ;;  %v555_v9 = vld [vmem:[%s986_s12] sm:$0xff] (%p949_p7)  ;;  %v557_v10 = vld [vmem:[%s986_s12 + $0x8] sm:$0xff] (%p949_p7) }
  0xd4   : > { %498 = vst.msk [vmem:[%s986_s12 + $0x28] sm:$0xff] %vm492_vm0, %v489_v1  ;;  %497 = vst.msk [vmem:[%s986_s12 + $0x20] sm:$0xff] %vm492_vm0, %v488_v2  ;;  %v483_v5 = vadd.f32 %v474_v3, %v395_v63  ;;  %v482_v6 = vadd.f32 %v470_v4, %v394_v0 }
  0xd5   : > { %556 = vst [vmem:[%s513_s8] sm:$0xff] (%p949_p7), %v555_v9  ;;  %558 = vst [vmem:[%s513_s8 + $0x20] sm:$0xff] (%p949_p7), %v557_v10 }
  0xd6   : > { %v491_v7 = vmax.f32 %v483_v5, 0.0  ;;  %v490_v8 = vmax.f32 %v482_v6, 0.0 }
  0xd7   : > { %v559_v11 = vld [vmem:[%s986_s12 + $0x10] sm:$0xff] (%p949_p7)  ;;  %v561_v12 = vld [vmem:[%s986_s12 + $0x18] sm:$0xff] (%p949_p7) }
  0xd8   : > { %500 = vst.msk [vmem:[%s986_s12 + $0x38] sm:$0xff] %vm492_vm0, %v491_v7  ;;  %499 = vst.msk [vmem:[%s986_s12 + $0x30] sm:$0xff] %vm492_vm0, %v490_v8 }
  0xd9   : > { %560 = vst [vmem:[%s513_s8 + $0x40] sm:$0xff] %v559_v11  ;;  %562 = vst [vmem:[%s513_s8 + $0x60] sm:$0xff] %v561_v12 }
  0xdb   : > { %v563_v13 = vld [vmem:[%s986_s12 + $0x20] sm:$0xff]  ;;  %v565_v14 = vld [vmem:[%s986_s12 + $0x28] sm:$0xff] }
  0xdc   : > { %564 = vst [vmem:[%s513_s8 + $0x80] sm:$0xff] %v563_v13  ;;  %566 = vst [vmem:[%s513_s8 + $0xa0] sm:$0xff] %v565_v14 }
  0xdf   : > { %v567_v15 = vld [vmem:[%s986_s12 + $0x30] sm:$0xff]  ;;  %v569_v16 = vld [vmem:[%s986_s12 + $0x38] sm:$0xff] }
  0xe0   : > { %568 = vst [vmem:[%s513_s8 + $0xc0] sm:$0xff] %v567_v15  ;;  %570 = vst [vmem:[%s513_s8 + $0xe0] sm:$0xff] %v569_v16 }
  0xe1 PF: > { %s13_s20 = sadd.s32 1, %s864_s20   ;;  %s1054_s12 = smov %s836_s13 }
  0xe2   : > { %p10_p0 = scmp.ge.s32.totalorder %s13_s20, 10   ;;  %s1055_s13 = smov %s959_s7 }
  0xe3   : > { %s1056_s14 = smov %s852_s17  ;;  %s1057_s15 = smov %s856_s18 }
  0xe4   : > { %s1058_s16 = smov %s860_s19  ;;  %s1059_s17 = smov %s1063_s21 }
  0xe5   : > { %s1060_s18 = smov %s1067_s22  ;;  %s1061_s19 = smov %s1071_s25 }
  0xe6   :  { %12 = sbr.rel (!%p10_p0) target bundleno = 5 (0x5), region = 149 }

// kernel: _lambda_.2
= control target key start
LH: loop header
LB: loop body
LE: loop exit
PB: predicated region body
PF: predicated region fallthrough
CT: control target
= control target key end

     0   :  { %s3010_s15 = smov 0   ;;  %s3012_s16 = smov 0   ;;  %s3895_s0 = inlined_call_operand.vmem [shape: f32[2,4,34,26], index: 0, kind: input, shape index: {}]   ;;  %s3896_s1 = inlined_call_operand.vmem [shape: f32[9,8,4], index: 1, kind: input, shape index: {}]   ;;  %s3897_s2 = inlined_call_operand.vmem [shape: f32[2,8,32,24], index: 2, kind: output, shape index: {0}]   ;;  %s3898_s3 = inlined_call_operand.vmem [shape: f32[2,2,8,24], index: 3, kind: output, shape index: {1}]   ;;  %s3899_s4 = inlined_call_operand.vmem [shape: f32[2,2,8,24], index: 4, kind: output, shape index: {2}]  }
   0x1   :  { %s3014_s17 = smov 0   ;;  %s3016_s18 = smov 0  }
   0x2   :  { %s3018_s19 = smov 0   ;;  %s3020_s20 = smov 0  }
   0x3   :  { %s3022_s21 = smov 0   ;;  %s3024_s22 = smov 0  }
   0x4   :  { %s3026_s23 = smov 0  }
   0x5 LB: > { %3904 = sst [smem:[#allocation3_spill]] %s2960_s22  ;;  %s27_s24 = sadd.s32 1, %s2952_s20  ;;  %s2964_s23 = sphi %s3026_s23, %s15_s23   ;;  %s2960_s22 = sphi %s3024_s22, %s3912_s22   ;;  %s2956_s21 = sphi %s3022_s21, %s3918_s21   ;;  %s2952_s20 = sphi %s3020_s20, %s3917_s20   ;;  %s2948_s19 = sphi %s3018_s19, %s3909_s19   ;;  %s2944_s18 = sphi %s3016_s18, %s3916_s18   ;;  %s2940_s17 = sphi %s3014_s17, %s3915_s17   ;;  %s2936_s16 = sphi %s3012_s16, %s3914_s16   ;;  %s2932_s15 = sphi %s3010_s15, %s3913_s15  }
   0x6   : > { %p28_p0 = scmp.ge.s32.totalorder %s27_s24, 2  ;;  %s30_s25 = sadd.s32 1, %s2956_s21 }
   0x7   : > { %s2704_s26 = sadd.s32 4294967295, %s2964_s23   ;;  %s2706_s27 = sshll.u32 %s2956_s21, 1 }
   0x8   : > { %s3920_s24 = smov (%p28_p0, %s27_s24), 0  ;;  %s3922_s25 = smov (!%p28_p0, %s30_s25), %s2956_s21 }
   0x9   : > { %3905 = sst [smem:[#allocation4_spill]] %s3920_s24  ;;  %s34_s28 = sadd.s32 1, %s2960_s22 }
   0xa   : > { %s86_s29 = sadd.s32 %s2952_s20, %s2706_s27  ;;  %p32_p1 = scmp.ge.s32.totalorder %s3922_s25, 2 }
   0xb   : > { %p104_p2 = scmp.ne.s32.totalorder %s2936_s16, %s2932_s15  ;;  %p105_p3 = scmp.eq.s32.totalorder %s2704_s26, 7 }
   0xc   : > { %p2710_p4 = scmp.ge.s32.totalorder %s2964_s23, 1  ;;  %s3924_s25 = smov (%p32_p1, %s3922_s25), 0 }
   0xd   : > { %3906 = sst [smem:[#allocation5_spill]] %s3924_s25  ;;  %s3926_s28 = smov (!%p32_p1, %s34_s28), %s2960_s22 }
   0xe   : > { %s2707_s30 = sshll.u32 %s3924_s25, 1  ;;  %p3071_p5 = por %p105_p3, %p104_p2 }
   0xf   : > { %p36_p6 = scmp.ge.s32.totalorder %s3926_s28, 2  ;;  %s88_s6 = sadd.s32 %s2707_s30, %s3920_s24 }
  0x10   : > { %s90_s7 = ssub.s32 %s86_s29, %s88_s6  ;;  %p196_p7 = scmp.lt.s32.totalorder %s2964_s23, 9 }
  0x11   : > { %s3928_s28 = smov (%p36_p6, %s3926_s28), 0  ;;  %s94_s10 = sadd.s32 1, %s2936_s16 }
  0x12   : > { %3908 = sst [smem:[#allocation6_spill]] %s3928_s28  ;;  %p197_p8 = pnand %p2710_p4, %p196_p7 }
  0x13   : > { %s89_s8 = ssub.s32 %s2960_s22, %s3928_s28  ;;  %p237_p10 = scmp.lt.s32.totalorder (!%p197_p8), %s2948_s19, 1  ;;  %v2966_v0 = vmov (!%p197_p8), 0.0   ;;  %v2969_v13 = vmov (!%p197_p8), 1983009808   ;;  %v274_v15 = vlaneseq (!%p197_p8)  ;;  %v2970_v27 = vmov (!%p197_p8), 1934713408  }
  0x14   : > { %s91_s9 = sor.u32 %s90_s7, %s89_s8  ;;  %200 = sbr.rel (%p197_p8) target bundleno = 807 (0x327), region = 28  ;;  %1248 = vmatprep.mubr.f32.mxu0 (!%p197_p8), %v2966_v0  ;;  %575 = vmatprep.mubr.f32.mxu1 (!%p197_p8), %v2966_v0  ;;  %v272_v14 = vunpack.c.l.s4 (!%p197_p8), %v2969_v13  ;;  %v304_v28 = vunpack.c.l.s4 (!%p197_p8), %v2970_v27  ;;  %vm365_vm0 = vcmask (!%p197_p8), 195584   ;;  %vm367_vm1 = vcmask (!%p197_p8), 392192  }
  0x15   : > { %p92_p9 = scmp.eq.s32.totalorder %s91_s9, 0  ;;  %p246_p11 = scmp.lt.s32.totalorder (!%p197_p8), %s2944_s18, 1  ;;  %v3157_v17 = vshrl.u32 (!%p197_p8), %v274_v15, 7  ;;  %vm369_vm2 = vcmask (!%p197_p8), 588800   ;;  %vm371_vm3 = vcmask (!%p197_p8), 785408   ;;  %vm373_vm4 = vcmask (!%p197_p8), 982016  }
  0x16   : > { %s2717_s12 = sshll.u32 (!%p197_p8), %s2944_s18, 1  ;;  %s2968_s24 = smov (!%p197_p8), 126   ;;  %v273_v16 = vunpack.c.0.s8 (!%p197_p8), %v272_v14  ;;  %v305_v33 = vunpack.c.0.s8 (!%p197_p8), %v304_v28  ;;  %vm375_vm5 = vcmask (!%p197_p8), 130048   ;;  %vm504_vm6 = vcmask (!%p197_p8), 1043456  }
  0x17   : > { %s3083_s11 = scalar_select %p92_p9, %s2936_s16, %s94_s10  }
  0x18   : > { %s3093_s29 = sadd.s32 (!%p197_p8), %s2940_s17, %s2717_s12  ;;  %v3163_v19 = vsub.s32 (!%p197_p8), %v273_v16, %v3157_v17  ;;  %v3179_v37 = vsub.s32 (!%p197_p8), %v305_v33, %v3157_v17  ;;  %s2971_s25 = smov (!%p197_p8), 24   ;;  %vm377_vm7 = vcmask (!%p197_p8), 326656   ;;  %vm500_vm8 = vcmask (!%p197_p8), 31744  }
  0x19   : > { %s2975_s30 = smov (!%p197_p8), 16   ;;  %s2976_s6 = smov (!%p197_p8), 96   ;;  %vm2069_vm9 = vcmask (!%p197_p8), 64512  }
  0x1a   : > { %p2766_p12 = scmp.ne.s32.totalorder (!%p197_p8), %s2940_s17, 0 }
  0x1b   : > { %s238_s13 = scalar_select %p237_p10, %s2948_s19, 1 }
  0x1c   : > { %s3930_s18 = smov (!%p246_p11, %s2944_s18), 1  ;;  %vm2369_vm11 = vcmask (!%p2766_p12), 1041409   ;;  %vm2371_vm12 = vcmask (!%p2766_p12), 1042434   ;;  %vm2373_vm13 = vcmask (!%p2766_p12), 1043459   ;;  %vm2375_vm14 = vcmask (!%p2766_p12), 1044484  }
  0x1d   : > { %s2790_s14 = smul.u32 160, %s238_s13  ;;  %s2713_s26 = sshll.u32 %s238_s13, 1  ;;  %vm2377_vm15 = vcmask (!%p2766_p12), 1045509  }
  0x1e   : > { %s249_s27 = sadd.s32 %s2713_s26, %s3930_s18  ;;  %s2718_s18 = sshll.u32 %s3093_s29, 3 }
  0x1f   : > { %s241_s7 = scalar_lea.vmem %s3895_s0, %s2790_s14  ;;  %s2714_s8 = sshll.u32 %s249_s27, 3 }
  0x20   : > { %s3101_s28 = scalar_lea.vmem %s3898_s3, %s2714_s8  ;;  %s3106_s22 = scalar_lea.vmem %s3899_s4, %s2714_s8 }
  0x21   : > { %s3111_s12 = scalar_lea.vmem %s241_s7, %s2718_s18  ;;  %s2967_s13 = smov 127  }
  0x22   : > { %v3114_v1 = vld [vmem:[%s3111_s12 + $0x51] sm:$0xff]  ;;  %v3117_v2 = vld [vmem:[%s3111_s12 + $0x1] sm:$0xff]  ;;  %v3128_v5 = vld [vmem:[%s3111_s12 + $0x79] sm:$0xff]  ;;  %s2972_s14 = smov 48   ;;  %s2973_s26 = smov 72  }
  0x23   : > { %1064 = vrot.lane.b32.xlu1 %v3114_v1, %s2967_s13  ;;  %1060 = vrot.lane.b32.xlu0 %v3117_v2, %s2967_s13  ;;  %v869_v3 = vcombine.low %v3117_v2, %v3114_v1  ;;  %v870_v4 = vcombine.high %v3117_v2, %v3114_v1  ;;  %v3131_v6 = vld [vmem:[%s3111_s12 + $0x29] sm:$0xff]  ;;  %v264_v10 = vld [vmem:[%s3111_s12] sm:$0xff]  ;;  %s2974_s27 = smov 120   ;;  %s2977_s7 = smov 40  }
  0x24   : > { %v885_v7 = vcombine.low %v3131_v6, %v3128_v5  ;;  %v886_v8 = vcombine.high %v3131_v6, %v3128_v5  ;;  %v265_v9 = vld [vmem:[%s3111_s12 + $0x28] sm:$0xff]  ;;  %v267_v11 = vld [vmem:[%s3111_s12 + $0x78] sm:$0xff]  ;;  %v266_v12 = vld [vmem:[%s3111_s12 + $0x50] sm:$0xff] }
  0x25   : > { %v2751_v18 = vld [vmem:[%s3111_s12 + $0x2a] sm:$0xff]  ;;  %v285_v20 = vcombine.low %v265_v9, %v267_v11  ;;  %v2750_v21 = vld [vmem:[%s3111_s12 + $0x2] sm:$0xff]  ;;  %v2753_v22 = vld [vmem:[%s3111_s12 + $0x7a] sm:$0xff]  ;;  %v269_v24 = vcombine.low %v264_v10, %v266_v12  ;;  %v286_v34 = vcombine.high %v265_v9, %v267_v11  ;;  %v270_v35 = vcombine.high %v264_v10, %v266_v12 }
  0x26   : > { %v2752_v23 = vld [vmem:[%s3111_s12 + $0x52] sm:$0xff]  ;;  %v1480_v25 = vcombine.low %v2751_v18, %v2753_v22  ;;  %v1481_v43 = vcombine.high %v2751_v18, %v2753_v22  ;;  %v3217_v63 = vrot.slane %v869_v3, %v3163_v19  ;;  %v3245_v14 = vrot.slane %v870_v4, %v3163_v19 }
  0x27   : > { %1066 = vrot.lane.b32.xlu1 %v3128_v5, %s2967_s13  ;;  %1062 = vrot.lane.b32.xlu0 %v3131_v6, %s2967_s13  ;;  %v1464_v26 = vcombine.low %v2750_v21, %v2752_v23  ;;  %v293_v29 = vrot.slane %v285_v20, %v3163_v19  ;;  %v277_v30 = vrot.slane %v269_v24, %v3163_v19 }
  0x28   : > { %v1488_v31 = vrot.slane %v1480_v25, %v3163_v19  ;;  %v300_v39 = vrot.slane %v286_v34, %v3163_v19  ;;  %v284_v40 = vrot.slane %v270_v35, %v3163_v19  ;;  %v1465_v44 = vcombine.high %v2750_v21, %v2752_v23 }
  0x29   : > { %v1472_v32 = vrot.slane %v1464_v26, %v3163_v19  ;;  %v301_v36 = vcombine.low %v277_v30, %v293_v29  ;;  %v302_v45 = vcombine.high %v277_v30, %v293_v29  ;;  %v1495_v50 = vrot.slane %v1481_v43, %v3163_v19 }
  0x2a   : > { %v317_v46 = vcombine.low %v284_v40, %v300_v39  ;;  %v1479_v51 = vrot.slane %v1465_v44, %v3163_v19  ;;  %v318_v55 = vcombine.high %v284_v40, %v300_v39  ;;  %v3251_v15 = vrot.slane %v886_v8, %v3163_v19 }
  0x2b   : > { %387 = vrot.lane.b32.xlu1 %v265_v9, %s2967_s13  ;;  %385 = vrot.lane.b32.xlu0 %v264_v10, %s2967_s13  ;;  %v1496_v38 = vcombine.low %v1472_v32, %v1488_v31  ;;  %v3186_v41 = vrot.slane %v301_v36, %v3179_v37  ;;  %v1497_v49 = vcombine.high %v1472_v32, %v1488_v31 }
  0x2c   : > { %v316_v52 = vrot.slane %v302_v45, %v3179_v37  ;;  %v325_v54 = vrot.slane %v317_v46, %v3179_v37  ;;  %v1512_v58 = vcombine.low %v1479_v51, %v1495_v50  ;;  %v332_v59 = vrot.slane %v318_v55, %v3179_v37 }
  0x2d   : > { %v3189_v42 = vrot.slane %v1496_v38, %v3179_v37  ;;  %v333_v47 = vcombine.high %v3186_v41, %v2966_v0  ;;  %v1511_v53 = vrot.slane %v1497_v49, %v3179_v37  ;;  %v1513_v62 = vcombine.high %v1479_v51, %v1495_v50 }
  0x2e   : > { %v334_v56 = vcombine.high %v316_v52, %v2966_v0  ;;  %v335_v57 = vcombine.high %v325_v54, %v2966_v0  ;;  %v1520_v61 = vrot.slane %v1512_v58, %v3179_v37  ;;  %v336_v3 = vcombine.high %v332_v59, %v2966_v0 }
  0x2f   : > { %391 = vrot.lane.b32.xlu1 %v267_v11, %s2967_s13  ;;  %389 = vrot.lane.b32.xlu0 %v266_v12, %s2967_s13  ;;  %v1528_v48 = vcombine.high %v3189_v42, %v2966_v0  ;;  %v1529_v60 = vcombine.high %v1511_v53, %v2966_v0  ;;  %v918_v16 = vcombine.high %v3245_v14, %v3251_v15 }
  0x33   : > { %1261 = vrot.lane.b32.xlu1 %v3131_v6, %s2968_s24  ;;  %1259 = vrot.lane.b32.xlu0 %v3117_v2, %s2968_s24 }
  0x37   : > { %1265 = vrot.lane.b32.xlu1 %v3128_v5, %s2968_s24  ;;  %1263 = vrot.lane.b32.xlu0 %v3114_v1, %s2968_s24 }
  0x3b   : > { %666 = vrot.lane.b32.xlu1 %v265_v9, %s2968_s24  ;;  %664 = vrot.lane.b32.xlu0 %v264_v10, %s2968_s24  ;;  %v3223_v9 = vrot.slane %v885_v7, %v3163_v19  ;;  %v1530_v10 = vcombine.high %v1520_v61, %v2966_v0 }
  0x3d   : > { %v902_v13 = vcombine.high %v3217_v63, %v3223_v9 }
  0x3f   : > { %670 = vrot.lane.b32.xlu1 %v267_v11, %s2968_s24  ;;  %668 = vrot.lane.b32.xlu0 %v266_v12, %s2968_s24  ;;  %v1527_v11 = vrot.slane %v1513_v62, %v3179_v37  ;;  %v901_v12 = vcombine.low %v3217_v63, %v3223_v9 }
  0x41   : > { %v1531_v7 = vcombine.high %v1527_v11, %v2966_v0 }
  0x43   : > { %1657 = vrot.lane.b32.xlu1 %v2751_v18, %s2967_s13  ;;  %1655 = vrot.lane.b32.xlu0 %v2750_v21, %s2967_s13 }
  0x47   : > { %1661 = vrot.lane.b32.xlu1 %v2753_v22, %s2967_s13  ;;  %1659 = vrot.lane.b32.xlu0 %v2752_v23, %s2967_s13 }
  0x4b   : > { %1856 = vrot.lane.b32.xlu1 %v2751_v18, %s2968_s24  ;;  %1854 = vrot.lane.b32.xlu0 %v2750_v21, %s2968_s24  ;;  %v917_v18 = vcombine.low %v3245_v14, %v3251_v15 }
  0x4f   : > { %1860 = vrot.lane.b32.xlu1 %v2753_v22, %s2968_s24  ;;  %1858 = vrot.lane.b32.xlu0 %v2752_v23, %s2968_s24  ;;  %s2978_s24 = smov 80  }
  0x53   : > { %338 = vrot.lane.b32.xlu1 %v333_v47, %s2971_s25  ;;  %1533 = vrot.lane.b32.xlu0 %v1528_v48, %s2971_s25 }
  0x57   : > { %342 = vrot.lane.b32.xlu1 %v316_v52, %s2972_s14  ;;  %1537 = vrot.lane.b32.xlu0 %v1511_v53, %s2972_s14 }
  0x5b   : > { %346 = vrot.lane.b32.xlu1 %v334_v56, %s2973_s26  ;;  %354 = vrot.lane.b32.xlu0 %v335_v57, %s2974_s27 }
  0x5f   : > { %358 = vrot.lane.b32.xlu1 %v332_v59, %s2975_s30  ;;  %1541 = vrot.lane.b32.xlu0 %v1529_v60, %s2973_s26 }
  0x63   : > { %1549 = vrot.lane.b32.xlu1 %v1530_v10, %s2974_s27  ;;  %1553 = vrot.lane.b32.xlu0 %v1527_v11, %s2975_s30 }
  0x67   : > { %350 = vrot.lane.b32.xlu1 %v325_v54, %s2976_s6  ;;  %362 = vrot.lane.b32.xlu0 %v336_v3, %s2977_s7 }
  0x6b   : > { %1545 = vrot.lane.b32.xlu1 %v1520_v61, %s2976_s6  ;;  %1557 = vrot.lane.b32.xlu0 %v1531_v7, %s2977_s7 }
  0x95   : > { %v1065_v20 = vpop.permute.xlu1 %1064  ;;  %v1061_v21 = vpop.permute.xlu0 %1060 }
  0x96   : > { %v1072_v22 = vcombine.low %v1061_v21, %v1065_v20  ;;  %v1073_v23 = vcombine.high %v1061_v21, %v1065_v20 }
  0x98   : > { %v3258_v25 = vrot.slane %v1072_v22, %v3163_v19  ;;  %v1087_v5 = vrot.slane %v1073_v23, %v3163_v19 }
  0x99   : > { %v1067_v24 = vpop.permute.xlu1 %1066  ;;  %v1063_v1 = vpop.permute.xlu0 %1062 }
  0x9a   : > { %v1088_v2 = vcombine.low %v1063_v1, %v1067_v24  ;;  %v1089_v4 = vcombine.high %v1063_v1, %v1067_v24 }
  0x9c   : > { %v3262_v6 = vrot.slane %v1088_v2, %v3163_v19  ;;  %v1103_v8 = vrot.slane %v1089_v4, %v3163_v19 }
  0x9d   : > { %v388_v26 = vpop.permute.xlu1 %387  ;;  %v386_v27 = vpop.permute.xlu0 %385 }
  0x9e   : > { %v1105_v28 = vcombine.high %v3258_v25, %v3262_v6  ;;  %v1121_v29 = vcombine.high %v1087_v5, %v1103_v8  ;;  %v1120_v32 = vcombine.low %v1087_v5, %v1103_v8 }
  0xa0   : > { %v3268_v30 = vrot.slane %v1121_v29, %v3179_v37  ;;  %v3271_v31 = vrot.slane %v1105_v28, %v3179_v37  ;;  %v3286_v48 = vrot.slane %v1120_v32, %v3179_v37 }
  0xa1   : > { %v392_v33 = vpop.permute.xlu1 %391  ;;  %v390_v34 = vpop.permute.xlu0 %389 }
  0xa2   : > { %v413_v35 = vcombine.low %v388_v26, %v392_v33  ;;  %v414_v36 = vcombine.high %v388_v26, %v392_v33  ;;  %v397_v38 = vcombine.low %v386_v27, %v390_v34  ;;  %v398_v39 = vcombine.high %v386_v27, %v390_v34  ;;  %1161 = vrot.lane.b32.xlu0 %v3268_v30, %s2975_s30 }
  0xa3   : > { %1145 = vrot.lane.b32.xlu1 %v3271_v31, %s2972_s14 }
  0xa4   : > { %v3278_v40 = vrot.slane %v413_v35, %v3163_v19  ;;  %v3281_v43 = vrot.slane %v397_v38, %v3163_v19  ;;  %v428_v44 = vrot.slane %v414_v36, %v3163_v19  ;;  %v412_v45 = vrot.slane %v398_v39, %v3163_v19 }
  0xa5   : > { %v1262_v46 = vpop.permute.xlu1 %1261  ;;  %v1260_v47 = vpop.permute.xlu0 %1259 }
  0xa6   : > { %v430_v49 = vcombine.high %v3281_v43, %v3278_v40  ;;  %v446_v51 = vcombine.high %v412_v45, %v428_v44  ;;  %v445_v62 = vcombine.low %v412_v45, %v428_v44 }
  0xa7   : > { %1153 = vrot.lane.b32.xlu1 %v3286_v48, %s2976_s6 }
  0xa8   : > { %v3293_v50 = vrot.slane %v430_v49, %v3179_v37  ;;  %v3306_v3 = vrot.slane %v446_v51, %v3179_v37  ;;  %v3316_v1 = vrot.slane %v445_v62, %v3179_v37  ;;  %v1104_v49 = vcombine.low %v3258_v25, %v3262_v6 }
  0xa9   : > { %v1266_v52 = vpop.permute.xlu1 %1265  ;;  %v1264_v53 = vpop.permute.xlu0 %1263 }
  0xaa   : > { %v1287_v54 = vcombine.low %v1262_v46, %v1266_v52  ;;  %v1288_v55 = vcombine.high %v1262_v46, %v1266_v52  ;;  %v1271_v56 = vcombine.low %v1260_v47, %v1264_v53  ;;  %v1272_v57 = vcombine.high %v1260_v47, %v1264_v53 }
  0xab   : > { %470 = vrot.lane.b32.xlu1 %v3293_v50, %s2972_s14  ;;  %v429_v53 = vcombine.low %v3281_v43, %v3278_v40  ;;  %v3375_v6 = vrot.slane %v1104_v49, %v3179_v37  ;;  %v1138_v40 = vcombine.high %v3286_v48, %v2966_v0 }
  0xac   : > { %v3298_v58 = vrot.slane %v1287_v54, %v3163_v19  ;;  %v1302_v59 = vrot.slane %v1288_v55, %v3163_v19  ;;  %v3302_v60 = vrot.slane %v1271_v56, %v3163_v19  ;;  %v1286_v61 = vrot.slane %v1272_v57, %v3163_v19 }
  0xad   : > { %v667_v10 = vpop.permute.xlu1 %666  ;;  %v665_v11 = vpop.permute.xlu0 %664  ;;  %v3380_v43 = vrot.slane %v429_v53, %v3179_v37  ;;  %v1136_v62 = vcombine.high %v3375_v6, %v2966_v0 }
  0xae   : > { %v1304_v7 = vcombine.high %v3302_v60, %v3298_v58  ;;  %v1320_v20 = vcombine.high %v1286_v61, %v1302_v59  ;;  %v1319_v22 = vcombine.low %v1286_v61, %v1302_v59 }
  0xaf   : > { %486 = vrot.lane.b32.xlu1 %v3306_v3, %s2975_s30 }
  0xb0   : > { %v3313_v21 = vrot.slane %v1304_v7, %v3179_v37  ;;  %v3329_v28 = vrot.slane %v1320_v20, %v3179_v37  ;;  %v1327_v35 = vrot.slane %v1319_v22, %v3179_v37  ;;  %v1303_v22 = vcombine.low %v3302_v60, %v3298_v58 }
  0xb1   : > { %v671_v23 = vpop.permute.xlu1 %670  ;;  %v669_v24 = vpop.permute.xlu0 %668 }
  0xb2   : > { %v692_v2 = vcombine.low %v667_v10, %v671_v23  ;;  %v693_v4 = vcombine.high %v667_v10, %v671_v23  ;;  %v676_v5 = vcombine.low %v665_v11, %v669_v24  ;;  %v677_v8 = vcombine.high %v665_v11, %v669_v24  ;;  %1344 = vrot.lane.b32.xlu0 %v3313_v21, %s2972_s14 }
  0xb3   : > { %478 = vrot.lane.b32.xlu1 %v3316_v1, %s2976_s6  ;;  %v461_v10 = vcombine.high %v3380_v43, %v2966_v0  ;;  %v1137_v23 = vcombine.high %v3271_v31, %v2966_v0  ;;  %v1139_v31 = vcombine.high %v3268_v30, %v2966_v0  ;;  %v3414_v58 = vrot.slane %v1303_v22, %v3179_v37 }
  0xb4   : > { %v3323_v26 = vrot.slane %v692_v2, %v3163_v19  ;;  %v3326_v27 = vrot.slane %v676_v5, %v3163_v19  ;;  %v3332_v29 = vrot.slane %v693_v4, %v3163_v19  ;;  %v3335_v32 = vrot.slane %v677_v8, %v3163_v19 }
  0xb5   : > { %v1658_v33 = vpop.permute.xlu1 %1657  ;;  %v1656_v34 = vpop.permute.xlu0 %1655  ;;  %v462_v5 = vcombine.high %v3293_v50, %v2966_v0 }
  0xb6   : > { %v709_v36 = vcombine.high %v3326_v27, %v3323_v26  ;;  %1360 = vrot.lane.b32.xlu0 %v3329_v28, %s2975_s30  ;;  %v725_v39 = vcombine.high %v3335_v32, %v3332_v29  ;;  %v708_v24 = vcombine.low %v3326_v27, %v3323_v26  ;;  %v1337_v26 = vcombine.high %v1327_v35, %v2966_v0 }
  0xb7   : > { %1352 = vrot.lane.b32.xlu1 %v1327_v35, %s2976_s6 }
  0xb8   : > { %v3344_v38 = vrot.slane %v709_v36, %v3179_v37  ;;  %v3361_v54 = vrot.slane %v725_v39, %v3179_v37  ;;  %v3424_v27 = vrot.slane %v708_v24, %v3179_v37 }
  0xb9   : > { %v1662_v44 = vpop.permute.xlu1 %1661  ;;  %v1660_v45 = vpop.permute.xlu0 %1659 }
  0xba   : > { %v1683_v46 = vcombine.low %v1658_v33, %v1662_v44  ;;  %v1667_v47 = vcombine.low %v1656_v34, %v1660_v45  ;;  %v1684_v2 = vcombine.high %v1658_v33, %v1662_v44  ;;  %v1668_v4 = vcombine.high %v1656_v34, %v1660_v45 }
  0xbb   : > { %749 = vrot.lane.b32.xlu1 %v3344_v38, %s2972_s14  ;;  %v1335_v34 = vcombine.high %v3414_v58, %v2966_v0  ;;  %v740_v35 = vcombine.high %v3424_v27, %v2966_v0  ;;  %v463_v45 = vcombine.high %v3316_v1, %v2966_v0 }
  0xbc   : > { %v3353_v51 = vrot.slane %v1683_v46, %v3163_v19  ;;  %v3356_v52 = vrot.slane %v1667_v47, %v3163_v19  ;;  %v3417_v60 = vrot.slane %v1684_v2, %v3163_v19  ;;  %v3420_v50 = vrot.slane %v1668_v4, %v3163_v19 }
  0xbd   : > { %v3363_v55 = vpop.permute.xlu1 %1856  ;;  %v3365_v56 = vpop.permute.xlu0 %1854  ;;  %v741_v47 = vcombine.high %v3344_v38, %v2966_v0 }
  0xbe   : > { %v1700_v57 = vcombine.high %v3356_v52, %v3353_v51  ;;  %v1715_v39 = vcombine.low %v3420_v50, %v3417_v60 }
  0xbf   : > { %765 = vrot.lane.b32.xlu1 %v3361_v54, %s2975_s30 }
  0xc0   : > { %v3372_v25 = vrot.slane %v1700_v57, %v3179_v37  ;;  %v1723_v49 = vrot.slane %v1715_v39, %v3179_v37  ;;  %v1336_v57 = vcombine.high %v3313_v21, %v2966_v0  ;;  %v464_v21 = vcombine.high %v3306_v3, %v2966_v0 }
  0xc1   : > { %v3382_v59 = vpop.permute.xlu1 %1860  ;;  %v3384_v61 = vpop.permute.xlu0 %1858  ;;  %v1338_v3 = vcombine.high %v3329_v28, %v2966_v0  ;;  %v916_v28 = vrot.slane %v902_v13, %v3179_v37 }
  0xc2   : > { %1740 = vrot.lane.b32.xlu0 %v3372_v25, %s2972_s14  ;;  %v1733_v1 = vcombine.high %v1723_v49, %v2966_v0  ;;  %v1867_v22 = vcombine.high %v3365_v56, %v3384_v61  ;;  %v1882_v63 = vcombine.low %v3363_v55, %v3382_v59  ;;  %v1866_v9 = vcombine.low %v3365_v56, %v3384_v61 }
  0xc3   : > { %1157 = vrot.lane.b32.xlu1 %v1138_v40, %s2974_s27  ;;  %v724_v40 = vcombine.low %v3335_v32, %v3332_v29  ;;  %v1732_v13 = vcombine.high %v3372_v25, %v2966_v0  ;;  %v743_v61 = vcombine.high %v3361_v54, %v2966_v0 }
  0xc4   : > { %v1881_v2 = vrot.slane %v1867_v22, %v3163_v19 }
  0xc5   : > { %v339_v48 = vpop.permute.xlu1 %338  ;;  %v1534_v11 = vpop.permute.xlu0 %1533  ;;  %v732_v29 = vrot.slane %v724_v40, %v3179_v37 }
  0xc6   : > { %1141 = vrot.lane.b32.xlu0 %v1136_v62, %s2971_s25  ;;  %v366_v7 = vsel %vm365_vm0, %v3186_v41, %v339_v48  ;;  %v1560_v20 = vsel %vm365_vm0, %v3189_v42, %v1534_v11  ;;  %v1699_v48 = vcombine.low %v3356_v52, %v3353_v51 }
  0xc7   : > { %466 = vrot.lane.b32.xlu1 %v461_v10, %s2971_s25  ;;  %v742_v4 = vcombine.high %v732_v29, %v2966_v0 }
  0xc8   : > { %v3483_v52 = vrot.slane %v1699_v48, %v3179_v37 }
  0xc9   : > { %v343_v8 = vpop.permute.xlu1 %342  ;;  %v1538_v41 = vpop.permute.xlu0 %1537 }
  0xca   : > { %1149 = vrot.lane.b32.xlu0 %v1137_v23, %s2973_s26  ;;  %v368_v42 = vsel %vm367_vm1, %v366_v7, %v343_v8  ;;  %v1561_v36 = vsel %vm367_vm1, %v1560_v20, %v1538_v41  ;;  %v3474_v7 = vrot.slane %v901_v12, %v3179_v37  ;;  %v1883_v12 = vcombine.high %v3363_v55, %v3382_v59 }
  0xcb   : > { %474 = vrot.lane.b32.xlu1 %v462_v5, %s2973_s26  ;;  %v1731_v23 = vcombine.high %v3483_v52, %v2966_v0  ;;  %v934_v8 = vcombine.high %v916_v28, %v2966_v0  ;;  %v1716_v41 = vcombine.high %v3420_v50, %v3417_v60  ;;  %v1874_v55 = vrot.slane %v1866_v9, %v3163_v19 }
  0xcc   : > { %v933_v20 = vcombine.high %v3474_v7, %v2966_v0  ;;  %v1897_v24 = vrot.slane %v1883_v12, %v3163_v19 }
  0xcd   : > { %v347_v33 = vpop.permute.xlu1 %346  ;;  %v3443_v46 = vpop.permute.xlu0 %354  ;;  %v1730_v56 = vrot.slane %v1716_v41, %v3179_v37 }
  0xce   : > { %1165 = vrot.lane.b32.xlu0 %v1139_v31, %s2977_s7  ;;  %v3428_v30 = vsel %vm369_vm2, %v368_v42, %v347_v33  ;;  %v1914_v5 = vcombine.low %v1881_v2, %v1897_v24  ;;  %v932_v42 = vrot.slane %v918_v16, %v3179_v37  ;;  %v1890_v31 = vrot.slane %v1882_v63, %v3163_v19 }
  0xcf   : > { %1356 = vrot.lane.b32.xlu1 %v1337_v26, %s2974_s27  ;;  %v925_v16 = vrot.slane %v917_v18, %v3179_v37  ;;  %v1734_v60 = vcombine.high %v1730_v56, %v2966_v0  ;;  %v1915_v18 = vcombine.high %v1881_v2, %v1897_v24 }
  0xd0   : > { %v1898_v59 = vcombine.low %v1874_v55, %v1890_v31  ;;  %v1899_v26 = vcombine.high %v1874_v55, %v1890_v31  ;;  %v936_v39 = vcombine.high %v932_v42, %v2966_v0 }
  0xd1   : > { %v3437_v44 = vpop.permute.xlu1 %358  ;;  %v1542_v38 = vpop.permute.xlu0 %1541  ;;  %v935_v15 = vcombine.high %v925_v16, %v2966_v0 }
  0xd2   : > { %1340 = vrot.lane.b32.xlu0 %v1335_v34, %s2971_s25  ;;  %v1562_v10 = vsel %vm369_vm2, %v1561_v36, %v1542_v38  ;;  %v1922_v36 = vrot.slane %v1914_v5, %v3179_v37  ;;  %v3538_v50 = vrot.slane %v1898_v59, %v3179_v37  ;;  %v1913_v14 = vrot.slane %v1899_v26, %v3179_v37 }
  0xd3   : > { %745 = vrot.lane.b32.xlu1 %v740_v35, %s2971_s25  ;;  %v1929_v34 = vrot.slane %v1915_v18, %v3179_v37 }
  0xd4   : > { %v1932_v25 = vcombine.high %v1922_v36, %v2966_v0  ;;  %v1930_v54 = vcombine.high %v3538_v50, %v2966_v0  ;;  %v1931_v33 = vcombine.high %v1913_v14, %v2966_v0 }
  0xd5   : > { %v3448_v53 = vpop.permute.xlu1 %1549  ;;  %v3556_v35 = vpop.permute.xlu0 %1553 }
  0xd6   : > { %482 = vrot.lane.b32.xlu0 %v463_v45, %s2974_s27  ;;  %v1933_v45 = vcombine.high %v1929_v34, %v2966_v0 }
  0xd7   : > { %753 = vrot.lane.b32.xlu1 %v741_v47, %s2973_s26 }
  0xd9   : > { %v3457_v62 = vpop.permute.xlu1 %350 }
  0xda   : > { %1348 = vrot.lane.b32.xlu0 %v1336_v57, %s2973_s26  ;;  %v363_v57 = vpop.permute.xlu0 %362 }
  0xdb   : > { %1752 = vrot.lane.b32.xlu1 %v1733_v1, %s2974_s27 }
  0xdd   : > { %v1546_v32 = vpop.permute.xlu1 %1545 }
  0xde   : > { %490 = vrot.lane.b32.xlu0 %v464_v21, %s2977_s7  ;;  %v1563_v11 = vsel %vm371_vm3, %v1562_v10, %v1546_v32  ;;  %v3560_v1 = vpop.permute.xlu0 %1557 }
  0xdf   : > { %757 = vrot.lane.b32.xlu1 %v732_v29, %s2976_s6  ;;  %v3478_v51 = vsel %vm373_vm4, %v1563_v11, %v3448_v53 }
  0xe2   : > { %1364 = vrot.lane.b32.xlu0 %v1338_v3, %s2977_s7 }
  0xe3   : > { %1748 = vrot.lane.b32.xlu1 %v1723_v49, %s2976_s6 }
  0xe6   : > { %1736 = vrot.lane.b32.xlu0 %v1731_v23, %s2971_s25 }
  0xe7   : > { %938 = vrot.lane.b32.xlu1 %v933_v20, %s2971_s25 }
  0xea   : > { %761 = vrot.lane.b32.xlu0 %v742_v4, %s2974_s27 }
  0xeb   : > { %942 = vrot.lane.b32.xlu1 %v916_v28, %s2972_s14 }
  0xee   : > { %1744 = vrot.lane.b32.xlu0 %v1732_v13, %s2973_s26 }
  0xef   : > { %946 = vrot.lane.b32.xlu1 %v934_v8, %s2973_s26 }
  0xf2   : > { %1756 = vrot.lane.b32.xlu0 %v1730_v56, %s2975_s30 }
  0xf3   : > { %958 = vrot.lane.b32.xlu1 %v932_v42, %s2975_s30 }
  0xf6   : > { %769 = vrot.lane.b32.xlu0 %v743_v61, %s2977_s7 }
  0xf7   : > { %1951 = vrot.lane.b32.xlu1 %v1932_v25, %s2974_s27 }
  0xfa   : > { %1760 = vrot.lane.b32.xlu0 %v1734_v60, %s2977_s7 }
  0xfb   : > { %950 = vrot.lane.b32.xlu1 %v925_v16, %s2976_s6 }
  0xfe   : > { %1935 = vrot.lane.b32.xlu0 %v1930_v54, %s2971_s25  ;;  %v376_v54 = vsel %vm375_vm5, %v3443_v46, %v3437_v44  ;;  %s2979_s25 = smov 8  }
  0xff   : > { %1947 = vrot.lane.b32.xlu1 %v1922_v36, %s2976_s6  ;;  %s2984_s6 = smov 88  }
 0x102   : > { %1939 = vrot.lane.b32.xlu0 %v1913_v14, %s2972_s14  ;;  %s2980_s14 = smov 32  }
 0x106   : > { %954 = vrot.lane.b32.xlu0 %v935_v15, %s2974_s27  ;;  %s2982_s27 = smov 56  }
 0x10a   : > { %1943 = vrot.lane.b32.xlu0 %v1931_v33, %s2973_s26  ;;  %s2981_s26 = smov 104  }
 0x10e   : > { %1955 = vrot.lane.b32.xlu0 %v1929_v34, %s2975_s30  ;;  %s2983_s30 = smov 112  }
 0x112   : > { %962 = vrot.lane.b32.xlu0 %v936_v39, %s2977_s7  ;;  %v2719_v39 = vld [vmem:[%s3896_s1 + $0x8] sm:$0xff] }
 0x114   : > { %v1162_v48 = vpop.permute.xlu0 %1161 }
 0x115   : > { %v1146_v47 = vpop.permute.xlu1 %1145 }
 0x116   : > { %1959 = vrot.lane.b32.xlu0 %v1933_v45, %s2977_s7  ;;  %v378_v45 = vsel %vm377_vm7, %v376_v54, %v363_v57  ;;  %s214_s7 = sand.u32 1, %s2932_s15  }
 0x119   : > { %v1154_v49 = vpop.permute.xlu1 %1153 }
 0x11d   : > { %v471_v40 = vpop.permute.xlu1 %470 }
 0x121   : > { %v487_v38 = vpop.permute.xlu1 %486 }
 0x124   : > { %v1345_v29 = vpop.permute.xlu0 %1344 }
 0x125   : > { %v479_v10 = vpop.permute.xlu1 %478 }
 0x128   : > { %v1361_v11 = vpop.permute.xlu0 %1360 }
 0x129   : > { %v1353_v21 = vpop.permute.xlu1 %1352 }
 0x12d   : > { %v3562_v32 = vpop.permute.xlu1 %749 }
 0x131   : > { %v3564_v3 = vpop.permute.xlu1 %765 }
 0x134   : > { %v3566_v20 = vpop.permute.xlu0 %1740 }
 0x135   : > { %v1158_v12 = vpop.permute.xlu1 %1157 }
 0x136   : > { %v1173_v41 = vsel %vm375_vm5, %v1158_v12, %v1162_v48  ;;  %v268_v48 = vld [vmem:[%s3896_s1] sm:$0xff] }
 0x138   : > { %v1142_v22 = vpop.permute.xlu0 %1141 }
 0x139   : > { %v1168_v23 = vsel %vm365_vm0, %v3375_v6, %v1142_v22  ;;  %v467_v28 = vpop.permute.xlu1 %466  ;;  %v2740_v6 = vld [vmem:[%s3896_s1 + $0x20] sm:$0xff] }
 0x13a   : > { %v1169_v2 = vsel %vm367_vm1, %v1168_v23, %v1146_v47  ;;  %v493_v56 = vsel %vm365_vm0, %v3380_v43, %v467_v28 }
 0x13b   : > { %v494_v16 = vsel %vm367_vm1, %v493_v56, %v471_v40 }
 0x13c   : > { %v1150_v24 = vpop.permute.xlu0 %1149 }
 0x13d   : > { %v1170_v4 = vsel %vm369_vm2, %v1169_v2, %v1150_v24  ;;  %v475_v5 = vpop.permute.xlu1 %474 }
 0x13e   : > { %v1171_v8 = vsel %vm371_vm3, %v1170_v4, %v1154_v49  ;;  %v495_v60 = vsel %vm369_vm2, %v494_v16, %v475_v5 }
 0x13f   : > { %v1172_v42 = vsel %vm373_vm4, %v1171_v8, %v1158_v12  ;;  %v496_v34 = vsel %vm371_vm3, %v495_v60, %v479_v10 }
 0x140   : > { %v1166_v63 = vpop.permute.xlu0 %1165 }
 0x141   : > { %v1357_v9 = vpop.permute.xlu1 %1356  ;;  %v1174_v13 = vsel %vm377_vm7, %v1173_v41, %v1166_v63 }
 0x142   : > { %2741 = vmatprep.subr.msk.mxu0 %vm504_vm6, %v1174_v13  ;;  %v1372_v49 = vsel %vm375_vm5, %v1357_v9, %v1361_v11 }
 0x143   : > { %2742 = vmatpush1.msk.msra.mxu0 %vm504_vm6, %v1172_v42 }
 0x144   : > { %v1341_v36 = vpop.permute.xlu0 %1340  ;;  %2743 = vmatmul.mubr.msk.f32.vlgmr.msra.gmra.mrb[0].mxu0 %vm500_vm8, %v2740_v6  ;;  %v2758_v6 = vld [vmem:[%s3896_s1 + $0x38] sm:$0xff] }
 0x145   : > { %v746_v31 = vpop.permute.xlu1 %745  ;;  %1447 = vmatprep.mubr.f32.mxu0 %v2966_v0  ;;  %v1367_v59 = vsel %vm365_vm0, %v3414_v58, %v1341_v36  ;;  %v372_v58 = vsel %vm371_vm3, %v3428_v30, %v3457_v62  ;;  %v1565_v30 = vsel %vm375_vm5, %v3448_v53, %v3556_v35 }
 0x146   : > { %v1368_v26 = vsel %vm367_vm1, %v1367_v59, %v1345_v29  ;;  %v374_v62 = vsel %vm373_vm4, %v372_v58, %v3443_v46  ;;  %v1566_v35 = vsel %vm377_vm7, %v1565_v30, %v3560_v1  ;;  %v2754_v1 = vld [vmem:[%s3896_s1 + $0x30] sm:$0xff]  ;;  %v772_v12 = vsel %vm365_vm0, %v3424_v27, %v746_v31 }
 0x147   : > { %v773_v28 = vsel %vm367_vm1, %v772_v12, %v3562_v32  ;;  %v2726_v32 = vld [vmem:[%s3896_s1 + $0x10] sm:$0xff] }
 0x148   : > { %v483_v55 = vpop.permute.xlu0 %482 }
 0x149   : > { %v754_v25 = vpop.permute.xlu1 %753  ;;  %v498_v14 = vsel %vm375_vm5, %v483_v55, %v487_v38  ;;  %v497_v44 = vsel %vm373_vm4, %v496_v34, %v483_v55  ;;  %v2744_v38 = vld [vmem:[%s3896_s1 + $0x28] sm:$0xff]  ;;  %v2736_v34 = vld [vmem:[%s3896_s1 + $0x18] sm:$0xff] }
 0x14a   : > { %v774_v2 = vsel %vm369_vm2, %v773_v28, %v754_v25 }
 0x14c   : > { %v1349_v61 = vpop.permute.xlu0 %1348 }
 0x14d   : > { %v1369_v15 = vsel %vm369_vm2, %v1368_v26, %v1349_v61  ;;  %v3595_v43 = vpop.permute.xlu1 %1752 }
 0x14e   : > { %v1370_v47 = vsel %vm371_vm3, %v1369_v15, %v1353_v21 }
 0x14f   : > { %v1371_v46 = vsel %vm373_vm4, %v1370_v47, %v1357_v9 }
 0x150   : > { %v491_v18 = vpop.permute.xlu0 %490 }
 0x151   : > { %v499_v33 = vsel %vm377_vm7, %v498_v14, %v491_v18  ;;  %v758_v53 = vpop.permute.xlu1 %757 }
 0x152   : > { %2720 = vmatprep.subr.msk.mxu1 %vm504_vm6, %v499_v33  ;;  %v775_v27 = vsel %vm371_vm3, %v774_v2, %v758_v53 }
 0x153   : > { %2721 = vmatpush1.msk.msra.mxu1 %vm504_vm6, %v497_v44 }
 0x154   : > { %v1365_v40 = vpop.permute.xlu0 %1364  ;;  %2723 = vmatprep.subr.msk.mxu1 %vm504_vm6, %v378_v45  ;;  %2722 = vmatmul.mubr.msk.f32.vlgmr.msra.gmra.mrb[0].mxu1 %vm500_vm8, %v2719_v39 }
 0x155   : > { %v1373_v57 = vsel %vm377_vm7, %v1372_v49, %v1365_v40  ;;  %2724 = vmatpush1.msk.msra.mxu1 %vm504_vm6, %v374_v62  ;;  %655 = vmatprep.mubr.f32.mxu1 %v2966_v0  ;;  %v1749_v21 = vpop.permute.xlu1 %1748  ;;  %v2762_v62 = vld [vmem:[%s3896_s1 + $0x40] sm:$0xff] }
 0x156   : > { %2745 = vmatprep.subr.msk.mxu0 %vm504_vm6, %v1373_v57 }
 0x157   : > { %2746 = vmatpush1.msk.msra.mxu0 %vm504_vm6, %v1371_v46 }
 0x158   : > { %v1737_v10 = vpop.permute.xlu0 %1736  ;;  %2755 = vmatprep.subr.msk.mxu0 %vm504_vm6, %v1566_v35  ;;  %2747 = vmatmul.mubr.msk.f32.vlgmr.msra.gmra.mrb[0].mxu0 %vm500_vm8, %v2744_v38 }
 0x159   : > { %2756 = vmatpush1.msk.msra.mxu0 %vm504_vm6, %v3478_v51  ;;  %1640 = vmatprep.mubr.f32.mxu0 %v2966_v0  ;;  %v939_v51 = vpop.permute.xlu1 %938  ;;  %v1763_v22 = vsel %vm365_vm0, %v3483_v52, %v1737_v10 }
 0x15a   : > { %v1764_v24 = vsel %vm367_vm1, %v1763_v22, %v3566_v20  ;;  %v965_v61 = vsel %vm365_vm0, %v3474_v7, %v939_v51 }
 0x15c   : > { %v762_v29 = vpop.permute.xlu0 %761  ;;  %2725 = vmatmul.mubr.msk.f32.vlgmr.msra.gmra.mrb[0].mxu1 %vm500_vm8, %v268_v48 }
 0x15d   : > { %852 = vmatprep.mubr.f32.mxu1 %v2966_v0  ;;  %v777_v4 = vsel %vm375_vm5, %v762_v29, %v3564_v3  ;;  %v943_v5 = vpop.permute.xlu1 %942  ;;  %v776_v63 = vsel %vm373_vm4, %v775_v27, %v762_v29 }
 0x15e   : > { %v966_v60 = vsel %vm367_vm1, %v965_v61, %v943_v5 }
 0x160   : > { %v1745_v11 = vpop.permute.xlu0 %1744  ;;  %2757 = vmatmul.mubr.msk.f32.vlgmr.msra.gmra.mrb[0].mxu0 %vm500_vm8, %v2754_v1 }
 0x161   : > { %1843 = vmatprep.mubr.f32.mxu0 %v2966_v0  ;;  %v1765_v8 = vsel %vm369_vm2, %v1764_v24, %v1745_v11  ;;  %v947_v42 = vpop.permute.xlu1 %946 }
 0x162   : > { %v1766_v20 = vsel %vm371_vm3, %v1765_v8, %v1749_v21  ;;  %v967_v14 = vsel %vm369_vm2, %v966_v60, %v947_v42 }
 0x163   : > { %v1767_v36 = vsel %vm373_vm4, %v1766_v20, %v3595_v43 }
 0x164   : > { %v1757_v23 = vpop.permute.xlu0 %1756 }
 0x165   : > { %v1768_v3 = vsel %vm375_vm5, %v3595_v43, %v1757_v23  ;;  %v959_v55 = vpop.permute.xlu1 %958 }
 0x168   : > { %v770_v41 = vpop.permute.xlu0 %769 }
 0x169   : > { %v778_v52 = vsel %vm377_vm7, %v777_v4, %v770_v41  ;;  %v1952_v59 = vpop.permute.xlu1 %1951  ;;  %v2224_v41 = vstv %s2718_s18  ;;  %s2711_s18 = sshll.u32 %s214_s7, 6 }
 0x16a   : > { %2727 = vmatprep.subr.msk.mxu1 %vm504_vm6, %v778_v52  ;;  %s3727_s15 = scalar_lea.vmem [#allocation2], %s2711_s18 }
 0x16b   : > { %2728 = vmatpush1.msk.msra.mxu1 %vm504_vm6, %v776_v63 }
 0x16c   : > { %v1761_v9 = vpop.permute.xlu0 %1760  ;;  %2729 = vmatmul.mubr.msk.f32.vlgmr.msra.gmra.mrb[0].mxu1 %vm500_vm8, %v2726_v32 }
 0x16d   : > { %v1769_v13 = vsel %vm377_vm7, %v1768_v3, %v1761_v9  ;;  %1045 = vmatprep.mubr.f32.mxu1 %v2966_v0  ;;  %v951_v26 = vpop.permute.xlu1 %950 }
 0x16e   : > { %2759 = vmatprep.subr.msk.mxu0 %vm504_vm6, %v1769_v13  ;;  %v968_v33 = vsel %vm371_vm3, %v967_v14, %v951_v26 }
 0x16f   : > { %2760 = vmatpush1.msk.msra.mxu0 %vm504_vm6, %v1767_v36 }
 0x170   : > { %v1936_v31 = vpop.permute.xlu0 %1935  ;;  %2761 = vmatmul.mubr.msk.f32.vlgmr.msra.gmra.mrb[0].mxu0 %vm500_vm8, %v2758_v6 }
 0x171   : > { %2042 = vmatprep.mubr.f32.mxu0 %v2966_v0  ;;  %v1962_v15 = vsel %vm365_vm0, %v3538_v50, %v1936_v31  ;;  %v1948_v39 = vpop.permute.xlu1 %1947 }
 0x174   : > { %v1940_v56 = vpop.permute.xlu0 %1939 }
 0x175   : > { %v1963_v43 = vsel %vm367_vm1, %v1962_v15, %v1940_v56  ;;  %v2225_v56 = vadd.s32 %v2224_v41, %v3157_v17  ;;  %vm2379_vm1 = vcmask (!%p2766_p12), 1046534  }
 0x177   : > { %vm2226_vm10 = vcmp.lt.s32.totalorder %v2225_v56, 24 }
 0x178   : > { %v955_v25 = vpop.permute.xlu0 %954 }
 0x179   : > { %v970_v0 = vsel %vm375_vm5, %v955_v25, %v959_v55  ;;  %v969_v44 = vsel %vm373_vm4, %v968_v33, %v955_v25 }
 0x17c   : > { %v1944_v16 = vpop.permute.xlu0 %1943 }
 0x17d   : > { %v1964_v18 = vsel %vm369_vm2, %v1963_v43, %v1944_v16  ;;  %vm2381_vm2 = vcmask (!%p2766_p12), 1047559  }
 0x17e   : > { %v1965_v50 = vsel %vm371_vm3, %v1964_v18, %v1948_v39 }
 0x17f   : > { %v1966_v49 = vsel %vm373_vm4, %v1965_v50, %v1952_v59 }
 0x180   : > { %v1956_v54 = vpop.permute.xlu0 %1955 }
 0x181   : > { %v1967_v45 = vsel %vm375_vm5, %v1952_v59, %v1956_v54 }
 0x184   : > { %v963_v58 = vpop.permute.xlu0 %962 }
 0x185   : > { %v971_v7 = vsel %vm377_vm7, %v970_v0, %v963_v58 }
 0x186   : > { %2737 = vmatprep.subr.msk.mxu1 %vm504_vm6, %v971_v7 }
 0x187   : > { %2738 = vmatpush1.msk.msra.mxu1 %vm504_vm6, %v969_v44 }
 0x188   : > { %v1960_v47 = vpop.permute.xlu0 %1959  ;;  %2739 = vmatmul.mubr.msk.f32.vlgmr.msra.gmra.mrb[0].mxu1 %vm500_vm8, %v2736_v34 }
 0x189   : > { %v1968_v30 = vsel %vm377_vm7, %v1967_v45, %v1960_v47 }
 0x18a   : > { %2763 = vmatprep.subr.msk.mxu0 %vm504_vm6, %v1968_v30 }
 0x18b   : > { %2764 = vmatpush1.msk.msra.mxu0 %vm504_vm6, %v1966_v49 }
 0x18c   : > { %2765 = vmatmul.mubr.msk.f32.vlgmr.msra.gmra.mrb[0].mxu0 %vm500_vm8, %v2762_v62 }
 0x25b   : > { %v1047_v40 = vpop.f32.mrb[0].mxu1 }
 0x25c   : > { %v1049_v57 = vpop.f32.mrb[1].mxu1 }
 0x25f   : > { %v2044_v38 = vpop.f32.mrb[0].mxu0 }
 0x260   : > { %v2774_v53 = vadd.f32 %v2044_v38, %v1047_v40  ;;  %v2046_v46 = vpop.f32.mrb[1].mxu0 }
 0x261   : > { %v2775_v35 = vadd.f32 %v2046_v46, %v1049_v57 }
 0x262   : > { %2055 = vrot.lane.b32.xlu0 %v2774_v53, %s2978_s24  ;;  %2065 = vrot.lane.b32.xlu1 %v2774_v53, %s2979_s25 }
 0x266   : > { %2061 = vrot.lane.b32.xlu0 %v2774_v53, %s2980_s14  ;;  %2052 = vrot.lane.b32.xlu1 %v2774_v53, %s2981_s26 }
 0x26a   : > { %2058 = vrot.lane.b32.xlu1 %v2774_v53, %s2982_s27  ;;  %2067 = vrot.lane.b32.xlu0 %v2775_v35, %s2979_s25 }
 0x26e   : > { %2072 = vrot.lane.b32.xlu1 %v2775_v35, %s2983_s30  ;;  %2075 = vrot.lane.b32.xlu0 %v2775_v35, %s2984_s6 }
 0x2d4   : > { %v2056_v10 = vpop.permute.xlu0 %2055  ;;  %v2066_v48 = vpop.permute.xlu1 %2065 }
 0x2d5   : > { %v2078_v51 = vcombine.low %v2774_v53, %v2056_v10  ;;  %v2079_v23 = vcombine.high %v2774_v53, %v2056_v10 }
 0x2d7   : > { %v2086_v4 = vrot.slane %v2078_v51, %v3163_v19  ;;  %v2093_v20 = vrot.slane %v2079_v23, %v3163_v19 }
 0x2d8   : > { %v2062_v21 = vpop.permute.xlu0 %2061  ;;  %v2053_v29 = vpop.permute.xlu1 %2052 }
 0x2dc   : > { %v2059_v1 = vpop.permute.xlu1 %2058  ;;  %v2068_v11 = vpop.permute.xlu0 %2067 }
 0x2dd   : > { %v2094_v12 = vcombine.low %v2053_v29, %v2059_v1  ;;  %v2095_v22 = vcombine.high %v2053_v29, %v2059_v1  ;;  %v2070_v8 = vsel %vm2069_vm9, %v2066_v48, %v2068_v11 }
 0x2df   : > { %v2102_v28 = vrot.slane %v2094_v12, %v3163_v19  ;;  %v2109_v5 = vrot.slane %v2095_v22, %v3163_v19 }
 0x2e0   : > { %v2073_v24 = vpop.permute.xlu1 %2072  ;;  %v2076_v2 = vpop.permute.xlu0 %2075 }
 0x2e1   : > { %v2110_v27 = vcombine.low %v2062_v21, %v2073_v24  ;;  %v2111_v52 = vcombine.high %v2062_v21, %v2073_v24  ;;  %v2126_v32 = vcombine.low %v2070_v8, %v2076_v2  ;;  %v2127_v63 = vcombine.high %v2070_v8, %v2076_v2 }
 0x2e2   : > { %v2142_v3 = vcombine.low %v2086_v4, %v2102_v28  ;;  %v2143_v9 = vcombine.high %v2086_v4, %v2102_v28  ;;  %v2158_v31 = vcombine.low %v2093_v20, %v2109_v5  ;;  %v2159_v55 = vcombine.high %v2093_v20, %v2109_v5 }
 0x2e3   : > { %v2118_v13 = vrot.slane %v2110_v27, %v3163_v19  ;;  %v2125_v6 = vrot.slane %v2111_v52, %v3163_v19  ;;  %v2134_v42 = vrot.slane %v2126_v32, %v3163_v19  ;;  %v2141_v36 = vrot.slane %v2127_v63, %v3163_v19 }
 0x2e4   : > { %v2150_v60 = vrot.slane %v2142_v3, %v3179_v37  ;;  %v2157_v26 = vrot.slane %v2143_v9, %v3179_v37  ;;  %v2166_v43 = vrot.slane %v2158_v31, %v3179_v37  ;;  %v2173_v17 = vrot.slane %v2159_v55, %v3179_v37 }
 0x2e5   : > { %v2174_v25 = vcombine.low %v2118_v13, %v2134_v42  ;;  %v2175_v59 = vcombine.high %v2118_v13, %v2134_v42  ;;  %v2190_v61 = vcombine.low %v2125_v6, %v2141_v36  ;;  %v2191_v16 = vcombine.high %v2125_v6, %v2141_v36 }
 0x2e7   : > { %v2182_v54 = vrot.slane %v2174_v25, %v3179_v37  ;;  %v2189_v14 = vrot.slane %v2175_v59, %v3179_v37  ;;  %v2198_v15 = vrot.slane %v2190_v61, %v3179_v37  ;;  %v2205_v19 = vrot.slane %v2191_v16, %v3179_v37 }
 0x2e9   : > { %v2206_v0 = vcombine.low %v2150_v60, %v2182_v54  ;;  %v2207_v18 = vcombine.high %v2150_v60, %v2182_v54  ;;  %v2208_v58 = vcombine.low %v2157_v26, %v2189_v14  ;;  %v2209_v33 = vcombine.high %v2157_v26, %v2189_v14 }
 0x2ea   : > { %v2210_v7 = vcombine.low %v2166_v43, %v2198_v15  ;;  %v2211_v34 = vcombine.high %v2166_v43, %v2198_v15  ;;  %v2212_v39 = vcombine.low %v2173_v17, %v2205_v19  ;;  %v2213_v44 = vcombine.high %v2173_v17, %v2205_v19 }
 0x2eb   : > { %2214 = vst.msk [vmem:[%s3727_s15] sm:$0xff] %vm365_vm0, %v2206_v0  ;;  %2215 = vst.msk [vmem:[%s3727_s15 + $0x8] sm:$0xff] %vm365_vm0, %v2207_v18  ;;  %v3738_v37 = vsel %vm2226_vm10, %v2206_v0, 0.0  ;;  %v3741_v50 = vsel %vm2226_vm10, %v2207_v18, 0.0  ;;  %v3744_v45 = vsel %vm2226_vm10, %v2208_v58, 0.0  ;;  %v3747_v47 = vsel %vm2226_vm10, %v2209_v33, 0.0 }
 0x2ec   : > { %2216 = vst.msk [vmem:[%s3727_s15 + $0x10] sm:$0xff] %vm365_vm0, %v2208_v58  ;;  %2217 = vst.msk [vmem:[%s3727_s15 + $0x18] sm:$0xff] %vm365_vm0, %v2209_v33  ;;  %v3758_v30 = vsel %vm2226_vm10, %v2210_v7, 0.0  ;;  %v3761_v62 = vsel %vm2226_vm10, %v2211_v34, 0.0  ;;  %v3764_v49 = vsel %vm2226_vm10, %v2212_v39, 0.0  ;;  %v3767_v40 = vsel %vm2226_vm10, %v2213_v44, 0.0 }
 0x2ed   : > { %2218 = vst.msk [vmem:[%s3727_s15 + $0x20] sm:$0xff] %vm365_vm0, %v2210_v7  ;;  %2219 = vst.msk [vmem:[%s3727_s15 + $0x28] sm:$0xff] %vm365_vm0, %v2211_v34  ;;  %v2237_v57 = vsel %vm365_vm0, %v3738_v37, 0.0  ;;  %v2244_v38 = vsel %vm365_vm0, %v3741_v50, 0.0  ;;  %v2251_v53 = vsel %vm365_vm0, %v3744_v45, 0.0  ;;  %v2258_v46 = vsel %vm365_vm0, %v3747_v47, 0.0 }
 0x2ee   : > { %2220 = vst.msk [vmem:[%s3727_s15 + $0x30] sm:$0xff] %vm365_vm0, %v2212_v39  ;;  %2221 = vst.msk [vmem:[%s3727_s15 + $0x38] sm:$0xff] %vm365_vm0, %v2213_v44  ;;  %v2238_v35 = vrot.slane %v2237_v57, 4  ;;  %v2245_v10 = vrot.slane %v2244_v38, 4  ;;  %v2252_v48 = vrot.slane %v2251_v53, 4  ;;  %v2259_v21 = vrot.slane %v2258_v46, 4 }
 0x2ef   : > { %v2265_v29 = vsel %vm365_vm0, %v3758_v30, 0.0  ;;  %v2272_v1 = vsel %vm365_vm0, %v3761_v62, 0.0  ;;  %v2279_v11 = vsel %vm365_vm0, %v3764_v49, 0.0  ;;  %v2286_v51 = vsel %vm365_vm0, %v3767_v40, 0.0 }
 0x2f0   : > { %v2239_v12 = vadd.f32 %v2238_v35, %v2237_v57  ;;  %v2246_v22 = vadd.f32 %v2245_v10, %v2244_v38  ;;  %v2253_v23 = vadd.f32 %v2252_v48, %v2251_v53  ;;  %v2260_v28 = vadd.f32 %v2259_v21, %v2258_v46 }
 0x2f1   : > { %v2266_v24 = vrot.slane %v2265_v29, 4  ;;  %v2273_v2 = vrot.slane %v2272_v1, 4  ;;  %v2280_v4 = vrot.slane %v2279_v11, 4  ;;  %v2287_v5 = vrot.slane %v2286_v51, 4 }
 0x2f2   : > { %v2240_v8 = vrot.slane %v2239_v12, 2  ;;  %v2247_v41 = vrot.slane %v2246_v22, 2  ;;  %v2254_v27 = vrot.slane %v2253_v23, 2  ;;  %v2261_v52 = vrot.slane %v2260_v28, 2 }
 0x2f3   : > { %v2267_v32 = vadd.f32 %v2266_v24, %v2265_v29  ;;  %v2274_v63 = vadd.f32 %v2273_v2, %v2272_v1  ;;  %v2281_v20 = vadd.f32 %v2280_v4, %v2279_v11  ;;  %v2288_v3 = vadd.f32 %v2287_v5, %v2286_v51 }
 0x2f4   : > { %v2241_v9 = vadd.f32 %v2240_v8, %v2239_v12  ;;  %v2248_v13 = vadd.f32 %v2247_v41, %v2246_v22  ;;  %v2255_v6 = vadd.f32 %v2254_v27, %v2253_v23  ;;  %v2262_v42 = vadd.f32 %v2261_v52, %v2260_v28 }
 0x2f5   : > { %v2268_v36 = vrot.slane %v2267_v32, 2  ;;  %v2275_v31 = vrot.slane %v2274_v63, 2  ;;  %v2282_v55 = vrot.slane %v2281_v20, 2  ;;  %v2289_v56 = vrot.slane %v2288_v3, 2 }
 0x2f6   : > { %v2242_v25 = vrot.slane %v2241_v9, 1  ;;  %v2249_v59 = vrot.slane %v2248_v13, 1  ;;  %v2256_v61 = vrot.slane %v2255_v6, 1  ;;  %v2263_v16 = vrot.slane %v2262_v42, 1 }
 0x2f7   : > { %v2269_v60 = vadd.f32 %v2268_v36, %v2267_v32  ;;  %v2276_v26 = vadd.f32 %v2275_v31, %v2274_v63  ;;  %v2283_v54 = vadd.f32 %v2282_v55, %v2281_v20  ;;  %v2290_v14 = vadd.f32 %v2289_v56, %v2288_v3 }
 0x2f8   : > { %v3785_v15 = vadd.f32 %v2242_v25, %v2241_v9  ;;  %v3787_v19 = vadd.f32 %v2249_v59, %v2248_v13  ;;  %v3789_v43 = vadd.f32 %v2256_v61, %v2255_v6  ;;  %v3791_v17 = vadd.f32 %v2263_v16, %v2262_v42 }
 0x2f9   : > { %v2270_v0 = vrot.slane %v2269_v60, 1  ;;  %v2277_v18 = vrot.slane %v2276_v26, 1  ;;  %v2284_v58 = vrot.slane %v2283_v54, 1  ;;  %v2291_v33 = vrot.slane %v2290_v14, 1 }
 0x2fa   : > { %v2293_v7 = vmul.f32 %v3738_v37, %v3738_v37  ;;  %v2294_v34 = vmul.f32 %v3741_v50, %v3741_v50  ;;  %v2295_v39 = vmul.f32 %v3744_v45, %v3744_v45  ;;  %v2296_v44 = vmul.f32 %v3747_v47, %v3747_v47 }
 0x2fb   : > { %v3801_v57 = vadd.f32 %v2270_v0, %v2269_v60  ;;  %v3803_v38 = vadd.f32 %v2277_v18, %v2276_v26  ;;  %v3805_v53 = vadd.f32 %v2284_v58, %v2283_v54  ;;  %v3807_v46 = vadd.f32 %v2291_v33, %v2290_v14 }
 0x2fc   : > { %v2297_v37 = vmul.f32 %v3758_v30, %v3758_v30  ;;  %v2298_v50 = vmul.f32 %v3761_v62, %v3761_v62  ;;  %v2299_v45 = vmul.f32 %v3764_v49, %v3764_v49  ;;  %v2300_v47 = vmul.f32 %v3767_v40, %v3767_v40 }
 0x2fd   : > { %v2301_v35 = vsel %vm365_vm0, %v2293_v7, 0.0  ;;  %v2308_v10 = vsel %vm365_vm0, %v2294_v34, 0.0  ;;  %v2315_v48 = vsel %vm365_vm0, %v2295_v39, 0.0  ;;  %v2322_v21 = vsel %vm365_vm0, %v2296_v44, 0.0 }
 0x2fe   : > { %v2302_v29 = vrot.slane %v2301_v35, 4  ;;  %v2309_v1 = vrot.slane %v2308_v10, 4  ;;  %v2316_v30 = vrot.slane %v2315_v48, 4  ;;  %v2323_v11 = vrot.slane %v2322_v21, 4 }
 0x2ff   : > { %v2329_v62 = vsel %vm365_vm0, %v2297_v37, 0.0  ;;  %v2336_v51 = vsel %vm365_vm0, %v2298_v50, 0.0  ;;  %v2343_v49 = vsel %vm365_vm0, %v2299_v45, 0.0  ;;  %v2350_v40 = vsel %vm365_vm0, %v2300_v47, 0.0 }
 0x300   : > { %v2303_v12 = vadd.f32 %v2302_v29, %v2301_v35  ;;  %v2310_v22 = vadd.f32 %v2309_v1, %v2308_v10  ;;  %v2317_v23 = vadd.f32 %v2316_v30, %v2315_v48  ;;  %v2324_v28 = vadd.f32 %v2323_v11, %v2322_v21 }
 0x301   : > { %v2330_v24 = vrot.slane %v2329_v62, 4  ;;  %v2337_v2 = vrot.slane %v2336_v51, 4  ;;  %v2344_v4 = vrot.slane %v2343_v49, 4  ;;  %v2351_v5 = vrot.slane %v2350_v40, 4 }
 0x302   : > { %v2304_v8 = vrot.slane %v2303_v12, 2  ;;  %v2311_v41 = vrot.slane %v2310_v22, 2  ;;  %v2318_v27 = vrot.slane %v2317_v23, 2  ;;  %v2325_v52 = vrot.slane %v2324_v28, 2 }
 0x303   : > { %v2331_v32 = vadd.f32 %v2330_v24, %v2329_v62  ;;  %v2338_v63 = vadd.f32 %v2337_v2, %v2336_v51  ;;  %v2345_v20 = vadd.f32 %v2344_v4, %v2343_v49  ;;  %v2352_v3 = vadd.f32 %v2351_v5, %v2350_v40 }
 0x304   : > { %v2305_v9 = vadd.f32 %v2304_v8, %v2303_v12  ;;  %v2312_v13 = vadd.f32 %v2311_v41, %v2310_v22  ;;  %v2319_v6 = vadd.f32 %v2318_v27, %v2317_v23  ;;  %v2326_v42 = vadd.f32 %v2325_v52, %v2324_v28 }
 0x305   : > { %v2332_v36 = vrot.slane %v2331_v32, 2  ;;  %v2339_v31 = vrot.slane %v2338_v63, 2  ;;  %v2346_v55 = vrot.slane %v2345_v20, 2  ;;  %v2353_v56 = vrot.slane %v2352_v3, 2  ;;  %2360 = sbr.rel (%p2766_p12) target bundleno = 787 (0x313), region = 32 }
 0x306   : > { %v2306_v25 = vrot.slane %v2305_v9, 1  ;;  %v2313_v59 = vrot.slane %v2312_v13, 1  ;;  %v2320_v61 = vrot.slane %v2319_v6, 1  ;;  %v2327_v16 = vrot.slane %v2326_v42, 1 }
 0x307   : > { %v2333_v60 = vadd.f32 %v2332_v36, %v2331_v32  ;;  %v2340_v26 = vadd.f32 %v2339_v31, %v2338_v63  ;;  %v2347_v54 = vadd.f32 %v2346_v55, %v2345_v20  ;;  %v2354_v14 = vadd.f32 %v2353_v56, %v2352_v3 }
 0x308   : > { %v2307_v0 = vadd.f32 %v2306_v25, %v2305_v9  ;;  %v2314_v18 = vadd.f32 %v2313_v59, %v2312_v13  ;;  %v2321_v58 = vadd.f32 %v2320_v61, %v2319_v6  ;;  %v2328_v33 = vadd.f32 %v2327_v16, %v2326_v42 }
 0x309   : > { %v2334_v7 = vrot.slane %v2333_v60, 1  ;;  %v2341_v34 = vrot.slane %v2340_v26, 1  ;;  %v2348_v39 = vrot.slane %v2347_v54, 1  ;;  %v2355_v44 = vrot.slane %v2354_v14, 1 }
 0x30a   : > { %v2370_v35 = vsel (!%p2766_p12), %vm2369_vm11, %v3787_v19, %v3785_v15  ;;  %v2393_v48 = vsel (!%p2766_p12), %vm2369_vm11, %v2314_v18, %v2307_v0 }
 0x30b   : > { %v2335_v37 = vadd.f32 %v2334_v7, %v2333_v60  ;;  %v2342_v50 = vadd.f32 %v2341_v34, %v2340_v26  ;;  %v2349_v45 = vadd.f32 %v2348_v39, %v2347_v54  ;;  %v2356_v47 = vadd.f32 %v2355_v44, %v2354_v14 }
 0x30c   : > { %v2372_v10 = vsel %vm2371_vm12, %v3789_v43, %v2370_v35  ;;  %v2394_v29 = vsel %vm2371_vm12, %v2321_v58, %v2393_v48 }
 0x30d   : > { %v2374_v21 = vsel %vm2373_vm13, %v3791_v17, %v2372_v10  ;;  %v2395_v30 = vsel %vm2373_vm13, %v2328_v33, %v2394_v29 }
 0x30e   : > { %v2376_v1 = vsel %vm2375_vm14, %v3801_v57, %v2374_v21  ;;  %v2396_v62 = vsel %vm2375_vm14, %v2335_v37, %v2395_v30 }
 0x30f   : > { %v2378_v11 = vsel %vm2377_vm15, %v3803_v38, %v2376_v1  ;;  %v2397_v49 = vsel %vm2377_vm15, %v2342_v50, %v2396_v62 }
 0x310   : > { %v2380_v51 = vsel %vm2379_vm1, %v3805_v53, %v2378_v11  ;;  %v2398_v12 = vsel %vm2379_vm1, %v2349_v45, %v2397_v49 }
 0x311   : > { %v2382_v40 = vsel %vm2381_vm2, %v3807_v46, %v2380_v51  ;;  %v2399_v22 = vsel %vm2381_vm2, %v2356_v47, %v2398_v12 }
 0x312   : > { %2384 = vst.msk [vmem:[%s3101_s28] sm:$0xff] %vm365_vm0, %v2382_v40  ;;  %2401 = vst.msk [vmem:[%s3106_s22] sm:$0xff] %vm365_vm0, %v2399_v22 }
 0x313 PF: > { %p2767_p13 = scmp.le.s32.totalorder %s2940_s17, 0 }
 0x314   : > { %vm2415_vm3 = vcmask (!%p2767_p13), 1041409   ;;  %vm2417_vm4 = vcmask (!%p2767_p13), 1042434   ;;  %vm2419_vm5 = vcmask (!%p2767_p13), 1043459   ;;  %vm2421_vm6 = vcmask (!%p2767_p13), 1044484  }
 0x315   : > { %2405 = sbr.rel (%p2767_p13) target bundleno = 799 (0x31f), region = 36  ;;  %v2416_v23 = vsel (!%p2767_p13), %vm2415_vm3, %v3787_v19, %v3785_v15  ;;  %vm2423_vm7 = vcmask (!%p2767_p13), 1045509   ;;  %v2441_v24 = vsel (!%p2767_p13), %vm2415_vm3, %v2314_v18, %v2307_v0  ;;  %vm2425_vm8 = vcmask (!%p2767_p13), 1046534  }
 0x316   : > { %v2418_v28 = vsel (!%p2767_p13), %vm2417_vm4, %v3789_v43, %v2416_v23  ;;  %v2442_v4 = vsel (!%p2767_p13), %vm2417_vm4, %v2321_v58, %v2441_v24  ;;  %vm2427_vm9 = vcmask (!%p2767_p13), 1047559  }
 0x317   : > { %v2420_v2 = vsel (!%p2767_p13), %vm2419_vm5, %v3791_v17, %v2418_v28  ;;  %v2443_v8 = vsel (!%p2767_p13), %vm2419_vm5, %v2328_v33, %v2442_v4 }
 0x318   : > { %v2422_v5 = vsel (!%p2767_p13), %vm2421_vm6, %v3801_v57, %v2420_v2  ;;  %v2444_v52 = vsel (!%p2767_p13), %vm2421_vm6, %v2335_v37, %v2443_v8 }
 0x319   : > { %v2406_v41 = vld [vmem:[%s3101_s28] sm:$0xff] (!%p2767_p13)  ;;  %v2424_v27 = vsel (!%p2767_p13), %vm2423_vm7, %v3803_v38, %v2422_v5  ;;  %v2445_v43 = vsel (!%p2767_p13), %vm2423_vm7, %v2342_v50, %v2444_v52 }
 0x31a   : > { %v2426_v15 = vsel (!%p2767_p13), %vm2425_vm8, %v3805_v53, %v2424_v27  ;;  %v2432_v19 = vld [vmem:[%s3106_s22] sm:$0xff] (!%p2767_p13)  ;;  %v2446_v63 = vsel (!%p2767_p13), %vm2425_vm8, %v2349_v45, %v2445_v43 }
 0x31b   : > { %v2428_v32 = vsel (!%p2767_p13), %vm2427_vm9, %v3807_v46, %v2426_v15  ;;  %v2447_v20 = vsel (!%p2767_p13), %vm2427_vm9, %v2356_v47, %v2446_v63 }
 0x31c   : > { %v2430_v17 = vadd.f32 %v2428_v32, %v2406_v41  ;;  %v2449_v3 = vadd.f32 %v2447_v20, %v2432_v19 }
 0x31e   : > { %2431 = vst.msk [vmem:[%s3101_s28] sm:$0xff] %vm365_vm0, %v2430_v17  ;;  %2450 = vst.msk [vmem:[%s3106_s22] sm:$0xff] %vm365_vm0, %v2449_v3 }
 0x31f PF: > { %2473 = sbr.rel (!%p3071_p5) target bundleno = 807 (0x327), region = 40  ;;  %s2770_s17 = sshll.u32 (%p3071_p5), %s2948_s19, 5  ;;  %v2521_v57 = vld [vmem:[%s3727_s15] sm:$0xff] (%p3071_p5)  ;;  %v2523_v38 = vld [vmem:[%s3727_s15 + $0x8] sm:$0xff] (%p3071_p5)  ;;  %v2525_v53 = vld [vmem:[%s3727_s15 + $0x10] sm:$0xff] (%p3071_p5) }
 0x320   : > { %s2477_s28 = sadd.s32 (%p3071_p5), %s2770_s17, %s3093_s29  ;;  %v2527_v46 = vld [vmem:[%s3727_s15 + $0x18] sm:$0xff] (%p3071_p5)  ;;  %v2529_v9 = vld [vmem:[%s3727_s15 + $0x20] sm:$0xff] (%p3071_p5)  ;;  %v2531_v13 = vld [vmem:[%s3727_s15 + $0x28] sm:$0xff] (%p3071_p5) }
 0x321   : > { %s2771_s22 = sshll.u32 (%p3071_p5), %s2477_s28, 3  ;;  %v2533_v6 = vld [vmem:[%s3727_s15 + $0x30] sm:$0xff] (%p3071_p5)  ;;  %v2535_v42 = vld [vmem:[%s3727_s15 + $0x38] sm:$0xff] (%p3071_p5) }
 0x322   : > { %s2479_s9 = scalar_lea.vmem (%p3071_p5), %s3897_s2, %s2771_s22 }
 0x323   : > { %2522 = vst [vmem:[%s2479_s9] sm:$0xff] (%p3071_p5), %v2521_v57  ;;  %2524 = vst [vmem:[%s2479_s9 + $0x20] sm:$0xff] (%p3071_p5), %v2523_v38 }
 0x324   : > { %2526 = vst [vmem:[%s2479_s9 + $0x40] sm:$0xff] (%p3071_p5), %v2525_v53  ;;  %2528 = vst [vmem:[%s2479_s9 + $0x60] sm:$0xff] (%p3071_p5), %v2527_v46 }
 0x325   : > { %2530 = vst [vmem:[%s2479_s9 + $0x80] sm:$0xff] (%p3071_p5), %v2529_v9  ;;  %2532 = vst [vmem:[%s2479_s9 + $0xa0] sm:$0xff] (%p3071_p5), %v2531_v13 }
 0x326   : > { %2534 = vst [vmem:[%s2479_s9 + $0xc0] sm:$0xff] %v2533_v6  ;;  %2536 = vst [vmem:[%s2479_s9 + $0xe0] sm:$0xff] %v2535_v42 }
 0x327 PF: > { %s15_s23 = sadd.s32 1, %s2964_s23   ;;  %s3909_s19 = sld [smem:[#allocation3_spill]] }
 0x328   : > { %p12_p0 = scmp.ge.s32.totalorder %s15_s23, 10   ;;  %s3910_s29 = sld [smem:[#allocation4_spill]] }
 0x329   : > { %s3911_s10 = sld [smem:[#allocation5_spill]]  ;;  %s3912_s22 = sld [smem:[#allocation6_spill]] }
 0x32a   : > { %s3913_s15 = smov %s2936_s16  ;;  %s3914_s16 = smov %s3083_s11 }
 0x32b   : > { %s3915_s17 = smov %s2952_s20  ;;  %s3916_s18 = smov %s2956_s21 }
 0x32c   :  { %14 = sbr.rel (!%p12_p0) target bundleno = 5 (0x5), region = 139 }
 0x32e   : > { %s3917_s20 = smov %s3910_s29 }
 0x32f   : > { %s3918_s21 = smov %s3911_s10 }

</bundles_post_ra>
